<compile_context>
chip_gen: v7x
topology: tpu7x:2x2x1
jax: 0.10.0
libtpu: 0.0.40
codegen_flags: <defaults>
</compile_context>

<pallas_src>
import jax
import jax.numpy as jnp
from jax.experimental import pallas as pl
from jax.experimental.pallas import tpu as pltpu


def _make_kernel(*, H, W, pad, KH, KW, TH, Wo):
    """Build the per-(batch, h-tile) conv kernel body."""

    def kernel(x_ref, w_ref, b_ref, o_ref, xpad_ref, acc_ref):
        # x_ref   : (1, H, W, Cc)       un-padded NHWC slab of batch element n
        # w_ref   : (KH*KW, Cc, CoutP)  tap-major weights (Cout zero-padded to 128)
        # b_ref   : (1, CoutP)          f32 bias (base-conv bias or zeros)
        # o_ref   : (1, TH*Wo, CoutP)   f32 output rows of this h-tile
        # xpad_ref: (H+2p, W+2p, Cc)    VMEM scratch: zero-padded image (persistent)
        # acc_ref : (TH*Wo, CoutP)      f32 accumulator scratch
        Cc = x_ref.shape[-1]
        h_idx = pl.program_id(1)

        # Stage + zero-pad the image once per batch element.  The input block
        # index is constant along the h grid axis, so the same VMEM block is
        # reused by every h-tile; the halo only ever exists in this scratch,
        # never in HBM (no jnp.pad round-trip in the wrapper).
        @pl.when(h_idx == 0)
        def _():
            xpad_ref[...] = jnp.zeros_like(xpad_ref)
            xpad_ref[pad:pad + H, pad:pad + W, :] = x_ref[0].astype(xpad_ref.dtype)

        # Accumulate the KH*KW taps on the MXU into an f32 VMEM scratch,
        # starting from the (base-conv) bias.
        acc_ref[...] = jnp.broadcast_to(b_ref[...], acc_ref.shape)

        h0 = pl.multiple_of(h_idx * TH, TH)
        for kh in range(KH):
            # Contiguous slice along H only (full padded width).
            rows = xpad_ref[pl.ds(h0 + kh, TH), :, :]          # (TH, Wp, Cc)
            for kw in range(KW):
                patch = rows[:, kw:kw + Wo, :]                 # (TH, Wo, Cc)
                acc_ref[...] += jnp.dot(
                    patch.reshape(TH * Wo, Cc),
                    w_ref[kh * KW + kw],
                    preferred_element_type=jnp.float32)

        o_ref[...] = acc_ref[...].reshape(o_ref.shape).astype(o_ref.dtype)

    return kernel


def posnegconv_tensorbiased_forward(x, newweight, base_weight, base_bias,
                                    inputfornewbias, *, padding=1,
                                    ignorebias=False,
                                    compute_dtype=jnp.bfloat16):
    """Forward pass of posnegconv_tensorbiased as a single fused Pallas conv.

    x              : (N, Cin, H, W)       NCHW activations
    newweight      : (Cout, Cin, KH, KW)  tensorbiased conv weight
    base_weight    : (Cout, Cin, KH, KW)  base conv weight (tensor bias path)
    base_bias      : (Cout,) or None      base conv bias   (tensor bias path)
    inputfornewbias: (Cin,) or None       per-channel constant for the tensor bias
    """
    if x.ndim != 4:
        raise ValueError("expected NCHW input")   # mirrors the module's exit() guard
    N, Cin, H, W = x.shape
    Cout, _, KH, KW = newweight.shape
    Ho = H + 2 * padding - KH + 1
    Wo = W + 2 * padding - KW + 1
    # TODO(synk): stride>1 / dilation>1 / groups>1 of the wrapped conv are not handled.

    # ---- sign handling + pos/neg/tensor-bias fusion along input channels ----
    xs = [jnp.maximum(x, 0.0), jnp.minimum(x, 0.0)]
    ws = [jnp.maximum(newweight, 0.0), jnp.minimum(newweight, 0.0)]
    bias_vec = jnp.zeros((Cout,), jnp.float32)
    use_tensorbias = (not ignorebias) and (inputfornewbias is not None)
    if use_tensorbias:
        xs.append(jnp.broadcast_to(inputfornewbias.reshape(1, Cin, 1, 1),
                                   (N, Cin, H, W)).astype(x.dtype))
        ws.append(base_weight)
        if base_bias is not None:
            bias_vec = base_bias.astype(jnp.float32)

    x_cat = jnp.concatenate(xs, axis=1)                       # (N, Cc, H, W)
    w_cat = jnp.concatenate(ws, axis=1)                       # (Cout, Cc, KH, KW)
    Cc = x_cat.shape[1]

    # ---- layout plumbing: NHWC activations, tap-major weights, lane-dense Cout
    # TODO(synk): the NCHW<->NHWC transposes could be dropped if the host model
    # kept NHWC activations end-to-end.
    x_nhwc = jnp.transpose(x_cat, (0, 2, 3, 1)).astype(compute_dtype)
    CoutP = max(128, ((Cout + 127) // 128) * 128)             # lane-dense output stores
    w_hwio = jnp.transpose(w_cat, (2, 3, 1, 0)).astype(compute_dtype)   # (KH,KW,Cc,Cout)
    w_pad = jnp.zeros((KH, KW, Cc, CoutP), compute_dtype).at[..., :Cout].set(w_hwio)
    w_pad = w_pad.reshape(KH * KW, Cc, CoutP)
    b_pad = jnp.zeros((1, CoutP), jnp.float32).at[0, :Cout].set(bias_vec)

    # h-tile: largest divisor of Ho giving ~128 matmul rows per grid step.
    TH = 1
    for cand in range(1, Ho + 1):
        if Ho % cand == 0 and cand * Wo <= 128:
            TH = cand
    grid = (N, Ho // TH)

    kernel = _make_kernel(H=H, W=W, pad=padding, KH=KH, KW=KW, TH=TH, Wo=Wo)

    flops = 2 * N * Ho * Wo * KH * KW * Cc * CoutP
    bytes_accessed = (x_nhwc.size * x_nhwc.dtype.itemsize
                      + w_pad.size * w_pad.dtype.itemsize
                      + b_pad.size * 4
                      + N * Ho * Wo * CoutP * 4)

    out_rows = pl.pallas_call(
        kernel,
        out_shape=jax.ShapeDtypeStruct((N, Ho * Wo, CoutP), jnp.float32),
        grid=grid,
        in_specs=[
            # One batch element per grid step; constant along the h axis so the
            # block is fetched once and reused by every h-tile of that image.
            pl.BlockSpec((1, H, W, Cc), lambda n, h: (n, 0, 0, 0)),
            pl.BlockSpec((KH * KW, Cc, CoutP), lambda n, h: (0, 0, 0)),
            pl.BlockSpec((1, CoutP), lambda n, h: (0, 0)),
        ],
        out_specs=pl.BlockSpec((1, TH * Wo, CoutP), lambda n, h: (n, h, 0)),
        scratch_shapes=[
            pltpu.VMEM((H + 2 * padding, W + 2 * padding, Cc), compute_dtype),
            pltpu.VMEM((TH * Wo, CoutP), jnp.float32),
        ],
        compiler_params=pltpu.CompilerParams(
            dimension_semantics=("parallel", "arbitrary"),
            vmem_limit_bytes=32 * 1024 * 1024),
        cost_estimate=pl.CostEstimate(flops=flops, transcendentals=0,
                                      bytes_accessed=bytes_accessed),
    )(x_nhwc, w_pad, b_pad)

    out = out_rows[..., :Cout].reshape(N, Ho, Wo, Cout)
    return jnp.transpose(out, (0, 3, 1, 2))                   # back to NCHW, f32


def _reference_forward(x, newweight, base_weight, base_bias, inputfornewbias,
                       *, padding=1, ignorebias=False,
                       compute_dtype=jnp.float32):
    """Pure-JAX (lax.conv) mirror of the PyTorch module's forward."""
    def conv(inp, w):
        return jax.lax.conv_general_dilated(
            inp.astype(compute_dtype), w.astype(compute_dtype),
            window_strides=(1, 1),
            padding=[(padding, padding), (padding, padding)],
            dimension_numbers=('NCHW', 'OIHW', 'NCHW'),
            preferred_element_type=jnp.float32)

    vp = conv(jnp.maximum(x, 0.0), jnp.maximum(newweight, 0.0))
    vn = conv(jnp.minimum(x, 0.0), jnp.minimum(newweight, 0.0))
    if ignorebias or inputfornewbias is None:
        return vp + vn
    N, Cin, H, W = x.shape
    const_img = jnp.broadcast_to(inputfornewbias.reshape(1, Cin, 1, 1), (1, Cin, H, W))
    tb = conv(const_img, base_weight)
    if base_bias is not None:
        tb = tb + base_bias.reshape(1, -1, 1, 1).astype(jnp.float32)
    vp = vp + jnp.maximum(tb, 0.0)
    vn = vn + jnp.minimum(tb, 0.0)
    return vp + vn


def _as_bf16_grid(a):
    # Round test inputs to the bf16 grid so the check is insensitive to MXU
    # operand-precision defaults (bf16 operands then yield exact products).
    return a.astype(jnp.bfloat16).astype(jnp.float32)


if __name__ == "__main__":
    key = jax.random.PRNGKey(0)
    kx, kw, kbw, kbb, kin = jax.random.split(key, 5)

    N, Cin, H, W = 2, 4, 16, 16
    Cout, KH, KW = 8, 3, 3

    x = _as_bf16_grid(jax.random.normal(kx, (N, Cin, H, W), dtype=jnp.float32))
    newweight = _as_bf16_grid(jax.random.normal(kw, (Cout, Cin, KH, KW), dtype=jnp.float32))
    base_weight = _as_bf16_grid(jax.random.normal(kbw, (Cout, Cin, KH, KW), dtype=jnp.float32))
    base_bias = _as_bf16_grid(jax.random.normal(kbb, (Cout,), dtype=jnp.float32))
    inputfornewbias = _as_bf16_grid(jax.random.normal(kin, (Cin,), dtype=jnp.float32))

    cases = [
        dict(ignorebias=False, compute_dtype=jnp.float32, atol=1e-3, rtol=1e-3),
        dict(ignorebias=True,  compute_dtype=jnp.float32, atol=1e-3, rtol=1e-3),
        dict(ignorebias=False, compute_dtype=jnp.bfloat16, atol=2e-2, rtol=2e-2),
    ]

    ok = True
    for case in cases:
        out = posnegconv_tensorbiased_forward(
            x, newweight, base_weight, base_bias, inputfornewbias,
            padding=1, ignorebias=case['ignorebias'],
            compute_dtype=case['compute_dtype'])
        out = jax.block_until_ready(out)
        ref = _reference_forward(
            x, newweight, base_weight, base_bias, inputfornewbias,
            padding=1, ignorebias=case['ignorebias'],
            compute_dtype=case['compute_dtype'])
        ok = ok and bool(jnp.allclose(out, ref, atol=case['atol'], rtol=case['rtol']))

    print("KERNEL_OK" if ok else "MISMATCH")
</pallas_src>

<mosaic_0001>
module attributes {stable_mosaic.version = 11 : i64} {
  func.func @kernel(%arg0: i32, %arg1: i32, %arg2: memref<1x16x16x12xf32, #tpu.memory_space<vmem>>, %arg3: memref<9x12x128xf32, #tpu.memory_space<vmem>>, %arg4: memref<1x128xf32, #tpu.memory_space<vmem>>, %arg5: memref<1x128x128xf32, #tpu.memory_space<vmem>>, %arg6: memref<18x18x12xf32, #tpu.memory_space<vmem>>, %arg7: memref<128x128xf32, #tpu.memory_space<vmem>>) attributes {dimension_semantics = [#tpu.dimension_semantics<parallel>, #tpu.dimension_semantics<arbitrary>], iteration_bounds = array<i64: 2, 2>, scalar_prefetch = 0 : i64, scratch_operands = 2 : i64, tpu.core_type = #tpu.core_type<tc>, window_params = [{transform_indices = @transform_0, window_bounds = array<i64: 1, 16, 16, 12>}, {pipeline_mode = #tpu.pipeline_mode<synchronous>, transform_indices = @transform_1, window_bounds = array<i64: 9, 12, 128>}, {pipeline_mode = #tpu.pipeline_mode<synchronous>, transform_indices = @transform_2, window_bounds = array<i64: 1, 128>}, {transform_indices = @transform_3, window_bounds = array<i64: 1, 128, 128>}]} {
    %c0_i32 = arith.constant 0 : i32
    %0 = arith.cmpi eq, %arg1, %c0_i32 : i32
    %1 = arith.extui %0 : i1 to i32
    %c0_i32_0 = arith.constant 0 : i32
    %2 = arith.cmpi ne, %1, %c0_i32_0 : i32
    scf.if %2 {
      %cst_79 = arith.constant 0.000000e+00 : f32
      %93 = vector.broadcast %cst_79 : f32 to vector<18x18x12xf32>
      %c0_80 = arith.constant 0 : index
      %c0_81 = arith.constant 0 : index
      %c0_82 = arith.constant 0 : index
      %94 = vector.load %arg6[%c0_80, %c0_81, %c0_82] : memref<18x18x12xf32, #tpu.memory_space<vmem>>, vector<18x18x12xf32>
      tpu.vector_store %arg6[%c0_80, %c0_81, %c0_82], %93 {strides = array<i32>} : memref<18x18x12xf32, #tpu.memory_space<vmem>>, vector<18x18x12xf32>,
      %c0_83 = arith.constant 0 : index
      %c0_84 = arith.constant 0 : index
      %c0_85 = arith.constant 0 : index
      %c0_86 = arith.constant 0 : index
      %95 = vector.load %arg2[%c0_83, %c0_84, %c0_85, %c0_86] : memref<1x16x16x12xf32, #tpu.memory_space<vmem>>, vector<1x16x16x12xf32>
      %96 = vector.shape_cast %95 : vector<1x16x16x12xf32> to vector<16x16x12xf32>
      %c1_87 = arith.constant 1 : index
      %c1_88 = arith.constant 1 : index
      %c0_89 = arith.constant 0 : index
      %97 = vector.load %arg6[%c1_87, %c1_88, %c0_89] : memref<18x18x12xf32, #tpu.memory_space<vmem>>, vector<16x16x12xf32>
      tpu.vector_store %arg6[%c1_87, %c1_88, %c0_89], %96 {strides = array<i32>} : memref<18x18x12xf32, #tpu.memory_space<vmem>>, vector<16x16x12xf32>,
    } else {
    }
    %c0 = arith.constant 0 : index
    %c0_1 = arith.constant 0 : index
    %3 = vector.load %arg4[%c0, %c0_1] : memref<1x128xf32, #tpu.memory_space<vmem>>, vector<1x128xf32>
    %4 = vector.shape_cast %3 : vector<1x128xf32> to vector<1x128xf32>
    %5 = vector.broadcast %4 : vector<1x128xf32> to vector<128x128xf32>
    %c0_2 = arith.constant 0 : index
    %c0_3 = arith.constant 0 : index
    %6 = vector.load %arg7[%c0_2, %c0_3] : memref<128x128xf32, #tpu.memory_space<vmem>>, vector<128x128xf32>
    tpu.vector_store %arg7[%c0_2, %c0_3], %5 {strides = array<i32>} : memref<128x128xf32, #tpu.memory_space<vmem>>, vector<128x128xf32>,
    %c8_i32 = arith.constant 8 : i32
    %7 = arith.muli %arg1, %c8_i32 : i32
    %8 = tpu.assume_multiple %7, 8 : i32
    %c0_i32_4 = arith.constant 0 : i32
    %9 = arith.addi %8, %c0_i32_4 : i32
    %10 = arith.index_cast %9 : i32 to index
    %c0_5 = arith.constant 0 : index
    %c0_6 = arith.constant 0 : index
    %11 = vector.load %arg6[%10, %c0_5, %c0_6] : memref<18x18x12xf32, #tpu.memory_space<vmem>>, vector<8x18x12xf32>
    %12 = vector.extract_strided_slice %11 {offsets = [0, 0, 0], sizes = [8, 16, 12], strides = [1, 1, 1]} : vector<8x18x12xf32> to vector<8x16x12xf32>
    %c0_7 = arith.constant 0 : index
    %c0_8 = arith.constant 0 : index
    %13 = vector.load %arg7[%c0_7, %c0_8] : memref<128x128xf32, #tpu.memory_space<vmem>>, vector<128x128xf32>
    %14 = vector.shape_cast %12 : vector<8x16x12xf32> to vector<128x12xf32>
    %c0_9 = arith.constant 0 : index
    %c0_10 = arith.constant 0 : index
    %c0_11 = arith.constant 0 : index
    %15 = vector.load %arg3[%c0_9, %c0_10, %c0_11] : memref<9x12x128xf32, #tpu.memory_space<vmem>>, vector<1x12x128xf32>
    %16 = vector.shape_cast %15 : vector<1x12x128xf32> to vector<12x128xf32>
    %cst = arith.constant dense<0.000000e+00> : vector<128x128xf32>
    %17 = tpu.matmul %14, %16, %cst {dimension_numbers = #tpu.dot_dimension_numbers<[1], [0], [0], [1], [0, 0, 1, 1], [], []>} : vector<128x12xf32>, vector<12x128xf32>, vector<128x128xf32> -> vector<128x128xf32>
    %18 = arith.addf %13, %17 : vector<128x128xf32>
    %c0_12 = arith.constant 0 : index
    %c0_13 = arith.constant 0 : index
    %19 = vector.load %arg7[%c0_12, %c0_13] : memref<128x128xf32, #tpu.memory_space<vmem>>, vector<128x128xf32>
    tpu.vector_store %arg7[%c0_12, %c0_13], %18 {strides = array<i32>} : memref<128x128xf32, #tpu.memory_space<vmem>>, vector<128x128xf32>,
    %20 = vector.extract_strided_slice %11 {offsets = [0, 1, 0], sizes = [8, 16, 12], strides = [1, 1, 1]} : vector<8x18x12xf32> to vector<8x16x12xf32>
    %c0_14 = arith.constant 0 : index
    %c0_15 = arith.constant 0 : index
    %21 = vector.load %arg7[%c0_14, %c0_15] : memref<128x128xf32, #tpu.memory_space<vmem>>, vector<128x128xf32>
    %22 = vector.shape_cast %20 : vector<8x16x12xf32> to vector<128x12xf32>
    %c1 = arith.constant 1 : index
    %c0_16 = arith.constant 0 : index
    %c0_17 = arith.constant 0 : index
    %23 = vector.load %arg3[%c1, %c0_16, %c0_17] : memref<9x12x128xf32, #tpu.memory_space<vmem>>, vector<1x12x128xf32>
    %24 = vector.shape_cast %23 : vector<1x12x128xf32> to vector<12x128xf32>
    %cst_18 = arith.constant dense<0.000000e+00> : vector<128x128xf32>
    %25 = tpu.matmul %22, %24, %cst_18 {dimension_numbers = #tpu.dot_dimension_numbers<[1], [0], [0], [1], [0, 0, 1, 1], [], []>} : vector<128x12xf32>, vector<12x128xf32>, vector<128x128xf32> -> vector<128x128xf32>
    %26 = arith.addf %21, %25 : vector<128x128xf32>
    %c0_19 = arith.constant 0 : index
    %c0_20 = arith.constant 0 : index
    %27 = vector.load %arg7[%c0_19, %c0_20] : memref<128x128xf32, #tpu.memory_space<vmem>>, vector<128x128xf32>
    tpu.vector_store %arg7[%c0_19, %c0_20], %26 {strides = array<i32>} : memref<128x128xf32, #tpu.memory_space<vmem>>, vector<128x128xf32>,
    %28 = vector.extract_strided_slice %11 {offsets = [0, 2, 0], sizes = [8, 16, 12], strides = [1, 1, 1]} : vector<8x18x12xf32> to vector<8x16x12xf32>
    %c0_21 = arith.constant 0 : index
    %c0_22 = arith.constant 0 : index
    %29 = vector.load %arg7[%c0_21, %c0_22] : memref<128x128xf32, #tpu.memory_space<vmem>>, vector<128x128xf32>
    %30 = vector.shape_cast %28 : vector<8x16x12xf32> to vector<128x12xf32>
    %c2 = arith.constant 2 : index
    %c0_23 = arith.constant 0 : index
    %c0_24 = arith.constant 0 : index
    %31 = vector.load %arg3[%c2, %c0_23, %c0_24] : memref<9x12x128xf32, #tpu.memory_space<vmem>>, vector<1x12x128xf32>
    %32 = vector.shape_cast %31 : vector<1x12x128xf32> to vector<12x128xf32>
    %cst_25 = arith.constant dense<0.000000e+00> : vector<128x128xf32>
    %33 = tpu.matmul %30, %32, %cst_25 {dimension_numbers = #tpu.dot_dimension_numbers<[1], [0], [0], [1], [0, 0, 1, 1], [], []>} : vector<128x12xf32>, vector<12x128xf32>, vector<128x128xf32> -> vector<128x128xf32>
    %34 = arith.addf %29, %33 : vector<128x128xf32>
    %c0_26 = arith.constant 0 : index
    %c0_27 = arith.constant 0 : index
    %35 = vector.load %arg7[%c0_26, %c0_27] : memref<128x128xf32, #tpu.memory_space<vmem>>, vector<128x128xf32>
    tpu.vector_store %arg7[%c0_26, %c0_27], %34 {strides = array<i32>} : memref<128x128xf32, #tpu.memory_space<vmem>>, vector<128x128xf32>,
    %c1_i32 = arith.constant 1 : i32
    %36 = arith.addi %8, %c1_i32 : i32
    %37 = arith.index_cast %36 : i32 to index
    %c0_28 = arith.constant 0 : index
    %c0_29 = arith.constant 0 : index
    %38 = vector.load %arg6[%37, %c0_28, %c0_29] : memref<18x18x12xf32, #tpu.memory_space<vmem>>, vector<8x18x12xf32>
    %39 = vector.extract_strided_slice %38 {offsets = [0, 0, 0], sizes = [8, 16, 12], strides = [1, 1, 1]} : vector<8x18x12xf32> to vector<8x16x12xf32>
    %c0_30 = arith.constant 0 : index
    %c0_31 = arith.constant 0 : index
    %40 = vector.load %arg7[%c0_30, %c0_31] : memref<128x128xf32, #tpu.memory_space<vmem>>, vector<128x128xf32>
    %41 = vector.shape_cast %39 : vector<8x16x12xf32> to vector<128x12xf32>
    %c3 = arith.constant 3 : index
    %c0_32 = arith.constant 0 : index
    %c0_33 = arith.constant 0 : index
    %42 = vector.load %arg3[%c3, %c0_32, %c0_33] : memref<9x12x128xf32, #tpu.memory_space<vmem>>, vector<1x12x128xf32>
    %43 = vector.shape_cast %42 : vector<1x12x128xf32> to vector<12x128xf32>
    %cst_34 = arith.constant dense<0.000000e+00> : vector<128x128xf32>
    %44 = tpu.matmul %41, %43, %cst_34 {dimension_numbers = #tpu.dot_dimension_numbers<[1], [0], [0], [1], [0, 0, 1, 1], [], []>} : vector<128x12xf32>, vector<12x128xf32>, vector<128x128xf32> -> vector<128x128xf32>
    %45 = arith.addf %40, %44 : vector<128x128xf32>
    %c0_35 = arith.constant 0 : index
    %c0_36 = arith.constant 0 : index
    %46 = vector.load %arg7[%c0_35, %c0_36] : memref<128x128xf32, #tpu.memory_space<vmem>>, vector<128x128xf32>
    tpu.vector_store %arg7[%c0_35, %c0_36], %45 {strides = array<i32>} : memref<128x128xf32, #tpu.memory_space<vmem>>, vector<128x128xf32>,
    %47 = vector.extract_strided_slice %38 {offsets = [0, 1, 0], sizes = [8, 16, 12], strides = [1, 1, 1]} : vector<8x18x12xf32> to vector<8x16x12xf32>
    %c0_37 = arith.constant 0 : index
    %c0_38 = arith.constant 0 : index
    %48 = vector.load %arg7[%c0_37, %c0_38] : memref<128x128xf32, #tpu.memory_space<vmem>>, vector<128x128xf32>
    %49 = vector.shape_cast %47 : vector<8x16x12xf32> to vector<128x12xf32>
    %c4 = arith.constant 4 : index
    %c0_39 = arith.constant 0 : index
    %c0_40 = arith.constant 0 : index
    %50 = vector.load %arg3[%c4, %c0_39, %c0_40] : memref<9x12x128xf32, #tpu.memory_space<vmem>>, vector<1x12x128xf32>
    %51 = vector.shape_cast %50 : vector<1x12x128xf32> to vector<12x128xf32>
    %cst_41 = arith.constant dense<0.000000e+00> : vector<128x128xf32>
    %52 = tpu.matmul %49, %51, %cst_41 {dimension_numbers = #tpu.dot_dimension_numbers<[1], [0], [0], [1], [0, 0, 1, 1], [], []>} : vector<128x12xf32>, vector<12x128xf32>, vector<128x128xf32> -> vector<128x128xf32>
    %53 = arith.addf %48, %52 : vector<128x128xf32>
    %c0_42 = arith.constant 0 : index
    %c0_43 = arith.constant 0 : index
    %54 = vector.load %arg7[%c0_42, %c0_43] : memref<128x128xf32, #tpu.memory_space<vmem>>, vector<128x128xf32>
    tpu.vector_store %arg7[%c0_42, %c0_43], %53 {strides = array<i32>} : memref<128x128xf32, #tpu.memory_space<vmem>>, vector<128x128xf32>,
    %55 = vector.extract_strided_slice %38 {offsets = [0, 2, 0], sizes = [8, 16, 12], strides = [1, 1, 1]} : vector<8x18x12xf32> to vector<8x16x12xf32>
    %c0_44 = arith.constant 0 : index
    %c0_45 = arith.constant 0 : index
    %56 = vector.load %arg7[%c0_44, %c0_45] : memref<128x128xf32, #tpu.memory_space<vmem>>, vector<128x128xf32>
    %57 = vector.shape_cast %55 : vector<8x16x12xf32> to vector<128x12xf32>
    %c5 = arith.constant 5 : index
    %c0_46 = arith.constant 0 : index
    %c0_47 = arith.constant 0 : index
    %58 = vector.load %arg3[%c5, %c0_46, %c0_47] : memref<9x12x128xf32, #tpu.memory_space<vmem>>, vector<1x12x128xf32>
    %59 = vector.shape_cast %58 : vector<1x12x128xf32> to vector<12x128xf32>
    %cst_48 = arith.constant dense<0.000000e+00> : vector<128x128xf32>
    %60 = tpu.matmul %57, %59, %cst_48 {dimension_numbers = #tpu.dot_dimension_numbers<[1], [0], [0], [1], [0, 0, 1, 1], [], []>} : vector<128x12xf32>, vector<12x128xf32>, vector<128x128xf32> -> vector<128x128xf32>
    %61 = arith.addf %56, %60 : vector<128x128xf32>
    %c0_49 = arith.constant 0 : index
    %c0_50 = arith.constant 0 : index
    %62 = vector.load %arg7[%c0_49, %c0_50] : memref<128x128xf32, #tpu.memory_space<vmem>>, vector<128x128xf32>
    tpu.vector_store %arg7[%c0_49, %c0_50], %61 {strides = array<i32>} : memref<128x128xf32, #tpu.memory_space<vmem>>, vector<128x128xf32>,
    %c2_i32 = arith.constant 2 : i32
    %63 = arith.addi %8, %c2_i32 : i32
    %64 = arith.index_cast %63 : i32 to index
    %c0_51 = arith.constant 0 : index
    %c0_52 = arith.constant 0 : index
    %65 = vector.load %arg6[%64, %c0_51, %c0_52] : memref<18x18x12xf32, #tpu.memory_space<vmem>>, vector<8x18x12xf32>
    %66 = vector.extract_strided_slice %65 {offsets = [0, 0, 0], sizes = [8, 16, 12], strides = [1, 1, 1]} : vector<8x18x12xf32> to vector<8x16x12xf32>
    %c0_53 = arith.constant 0 : index
    %c0_54 = arith.constant 0 : index
    %67 = vector.load %arg7[%c0_53, %c0_54] : memref<128x128xf32, #tpu.memory_space<vmem>>, vector<128x128xf32>
    %68 = vector.shape_cast %66 : vector<8x16x12xf32> to vector<128x12xf32>
    %c6 = arith.constant 6 : index
    %c0_55 = arith.constant 0 : index
    %c0_56 = arith.constant 0 : index
    %69 = vector.load %arg3[%c6, %c0_55, %c0_56] : memref<9x12x128xf32, #tpu.memory_space<vmem>>, vector<1x12x128xf32>
    %70 = vector.shape_cast %69 : vector<1x12x128xf32> to vector<12x128xf32>
    %cst_57 = arith.constant dense<0.000000e+00> : vector<128x128xf32>
    %71 = tpu.matmul %68, %70, %cst_57 {dimension_numbers = #tpu.dot_dimension_numbers<[1], [0], [0], [1], [0, 0, 1, 1], [], []>} : vector<128x12xf32>, vector<12x128xf32>, vector<128x128xf32> -> vector<128x128xf32>
    %72 = arith.addf %67, %71 : vector<128x128xf32>
    %c0_58 = arith.constant 0 : index
    %c0_59 = arith.constant 0 : index
    %73 = vector.load %arg7[%c0_58, %c0_59] : memref<128x128xf32, #tpu.memory_space<vmem>>, vector<128x128xf32>
    tpu.vector_store %arg7[%c0_58, %c0_59], %72 {strides = array<i32>} : memref<128x128xf32, #tpu.memory_space<vmem>>, vector<128x128xf32>,
    %74 = vector.extract_strided_slice %65 {offsets = [0, 1, 0], sizes = [8, 16, 12], strides = [1, 1, 1]} : vector<8x18x12xf32> to vector<8x16x12xf32>
    %c0_60 = arith.constant 0 : index
    %c0_61 = arith.constant 0 : index
    %75 = vector.load %arg7[%c0_60, %c0_61] : memref<128x128xf32, #tpu.memory_space<vmem>>, vector<128x128xf32>
    %76 = vector.shape_cast %74 : vector<8x16x12xf32> to vector<128x12xf32>
    %c7 = arith.constant 7 : index
    %c0_62 = arith.constant 0 : index
    %c0_63 = arith.constant 0 : index
    %77 = vector.load %arg3[%c7, %c0_62, %c0_63] : memref<9x12x128xf32, #tpu.memory_space<vmem>>, vector<1x12x128xf32>
    %78 = vector.shape_cast %77 : vector<1x12x128xf32> to vector<12x128xf32>
    %cst_64 = arith.constant dense<0.000000e+00> : vector<128x128xf32>
    %79 = tpu.matmul %76, %78, %cst_64 {dimension_numbers = #tpu.dot_dimension_numbers<[1], [0], [0], [1], [0, 0, 1, 1], [], []>} : vector<128x12xf32>, vector<12x128xf32>, vector<128x128xf32> -> vector<128x128xf32>
    %80 = arith.addf %75, %79 : vector<128x128xf32>
    %c0_65 = arith.constant 0 : index
    %c0_66 = arith.constant 0 : index
    %81 = vector.load %arg7[%c0_65, %c0_66] : memref<128x128xf32, #tpu.memory_space<vmem>>, vector<128x128xf32>
    tpu.vector_store %arg7[%c0_65, %c0_66], %80 {strides = array<i32>} : memref<128x128xf32, #tpu.memory_space<vmem>>, vector<128x128xf32>,
    %82 = vector.extract_strided_slice %65 {offsets = [0, 2, 0], sizes = [8, 16, 12], strides = [1, 1, 1]} : vector<8x18x12xf32> to vector<8x16x12xf32>
    %c0_67 = arith.constant 0 : index
    %c0_68 = arith.constant 0 : index
    %83 = vector.load %arg7[%c0_67, %c0_68] : memref<128x128xf32, #tpu.memory_space<vmem>>, vector<128x128xf32>
    %84 = vector.shape_cast %82 : vector<8x16x12xf32> to vector<128x12xf32>
    %c8 = arith.constant 8 : index
    %c0_69 = arith.constant 0 : index
    %c0_70 = arith.constant 0 : index
    %85 = vector.load %arg3[%c8, %c0_69, %c0_70] : memref<9x12x128xf32, #tpu.memory_space<vmem>>, vector<1x12x128xf32>
    %86 = vector.shape_cast %85 : vector<1x12x128xf32> to vector<12x128xf32>
    %cst_71 = arith.constant dense<0.000000e+00> : vector<128x128xf32>
    %87 = tpu.matmul %84, %86, %cst_71 {dimension_numbers = #tpu.dot_dimension_numbers<[1], [0], [0], [1], [0, 0, 1, 1], [], []>} : vector<128x12xf32>, vector<12x128xf32>, vector<128x128xf32> -> vector<128x128xf32>
    %88 = arith.addf %83, %87 : vector<128x128xf32>
    %c0_72 = arith.constant 0 : index
    %c0_73 = arith.constant 0 : index
    %89 = vector.load %arg7[%c0_72, %c0_73] : memref<128x128xf32, #tpu.memory_space<vmem>>, vector<128x128xf32>
    tpu.vector_store %arg7[%c0_72, %c0_73], %88 {strides = array<i32>} : memref<128x128xf32, #tpu.memory_space<vmem>>, vector<128x128xf32>,
    %c0_74 = arith.constant 0 : index
    %c0_75 = arith.constant 0 : index
    %90 = vector.load %arg7[%c0_74, %c0_75] : memref<128x128xf32, #tpu.memory_space<vmem>>, vector<128x128xf32>
    %91 = vector.shape_cast %90 : vector<128x128xf32> to vector<1x128x128xf32>
    %c0_76 = arith.constant 0 : index
    %c0_77 = arith.constant 0 : index
    %c0_78 = arith.constant 0 : index
    %92 = vector.load %arg5[%c0_76, %c0_77, %c0_78] : memref<1x128x128xf32, #tpu.memory_space<vmem>>, vector<1x128x128xf32>
    tpu.vector_store %arg5[%c0_76, %c0_77, %c0_78], %91 {strides = array<i32>} : memref<1x128x128xf32, #tpu.memory_space<vmem>>, vector<1x128x128xf32>,
    return
  }
  func.func @transform_0(%arg0: i32, %arg1: i32) -> (i32, i32, i32, i32) {
    %c0_i32 = arith.constant 0 : i32
    %c0_i32_0 = arith.constant 0 : i32
    %c0_i32_1 = arith.constant 0 : i32
    %c0_i32_2 = arith.constant 0 : i32
    return %arg0, %c0_i32, %c0_i32_0, %c0_i32_1 : i32, i32, i32, i32
  }
  func.func @transform_1(%arg0: i32, %arg1: i32) -> (i32, i32, i32) {
    %c0_i32 = arith.constant 0 : i32
    %c0_i32_0 = arith.constant 0 : i32
    %c0_i32_1 = arith.constant 0 : i32
    %c0_i32_2 = arith.constant 0 : i32
    return %c0_i32, %c0_i32_0, %c0_i32_1 : i32, i32, i32
  }
  func.func @transform_2(%arg0: i32, %arg1: i32) -> (i32, i32) {
    %c0_i32 = arith.constant 0 : i32
    %c0_i32_0 = arith.constant 0 : i32
    %c0_i32_1 = arith.constant 0 : i32
    return %c0_i32, %c0_i32_0 : i32, i32
  }
  func.func @transform_3(%arg0: i32, %arg1: i32) -> (i32, i32, i32) {
    %c0_i32 = arith.constant 0 : i32
    %c0_i32_0 = arith.constant 0 : i32
    return %arg0, %arg1, %c0_i32 : i32, i32, i32
  }
}

</mosaic_0001>

<bundles_post_ra>
// kernel: tpu_custom_call.1
= control target key start
LH: loop header
LB: loop body
LE: loop exit
PB: predicated region body
PF: predicated region fallthrough
CT: control target
= control target key end

     0   :  { %8 = vsyncpa [#allocation5], 0  ;;  %s5117_s0 = inlined_call_operand.vmem [shape: f32[2,16,16,12], index: 0, kind: input, shape index: {}]   ;;  %s5118_s1 = inlined_call_operand.vmem [shape: f32[9,12,128], index: 1, kind: input, shape index: {}]   ;;  %s5119_s2 = inlined_call_operand.vmem [shape: f32[1,128], index: 2, kind: input, shape index: {}]   ;;  %s5120_s3 = inlined_call_operand.hbm [shape: f32[2,256,128], index: 3, kind: output, shape index: {}]  }
   0x1   :  { %10 = vsyncpa [#allocation5 + $0x1], 0  ;;  %s3991_s12 = smov 0   ;;  %s3993_s13 = smov 0  }
   0x2   :  { %s3995_s14 = smov 0   ;;  %s3997_s15 = smov 0  }
   0x3   :  { %s3999_s16 = smov 0   ;;  %s4001_s17 = smov 0  }
   0x4   :  { %s4003_s18 = smov 0   ;;  %s4005_s19 = smov 0  }
   0x5 LB: > { %s2941_s20 = sadd.s32 4294967295, %s3964_s19   ;;  %s2942_s21 = sadd.s32 4294967294, %s3964_s19   ;;  %s3964_s19 = sphi %s4005_s19, %s16_s19   ;;  %s3960_s18 = sphi %s4003_s18, %s5225_s18   ;;  %s3956_s17 = sphi %s4001_s17, %s5224_s17   ;;  %s3952_s16 = sphi %s3999_s16, %s5223_s16   ;;  %s3948_s15 = sphi %s3997_s15, %s5222_s15   ;;  %s3944_s14 = sphi %s3995_s14, %s5221_s14   ;;  %s3940_s13 = sphi %s3993_s13, %s5220_s13   ;;  %s3936_s12 = sphi %s3991_s12, %s5219_s12  }
   0x6   : > { %s25_s22 = sadd.s32 1, %s3956_s17  ;;  %s28_s23 = sadd.s32 1, %s3960_s18 }
   0x7   : > { %p26_p0 = scmp.ge.s32.totalorder %s25_s22, 2  ;;  %p115_p1 = scmp.ne.s32.totalorder %s3944_s14, %s3940_s13 }
   0x8   : > { %p116_p2 = scmp.eq.s32.totalorder %s2941_s20, 3  ;;  %p121_p5 = scmp.ne.s32.totalorder %s3940_s13, %s3936_s12 }
   0x9   : > { %s5227_s22 = smov (%p26_p0, %s25_s22), 0  ;;  %s5229_s23 = smov (!%p26_p0, %s28_s23), %s3960_s18 }
   0xa   : > { %s101_s24 = ssub.s32 %s3956_s17, %s5227_s22  ;;  %p4042_p3 = por %p116_p2, %p115_p1 }
   0xb   : > { %p30_p4 = scmp.ge.s32.totalorder %s5229_s23, 2  ;;  %p122_p6 = scmp.eq.s32.totalorder %s2942_s21, 3 }
   0xc   : > { %p2945_p7 = scmp.ge.s32.totalorder %s3964_s19, 1  ;;  %p154_p9 = scmp.lt.s32.totalorder %s3964_s19, 5 }
   0xd   : > { %s5231_s23 = smov (%p30_p4, %s5229_s23), 0  ;;  %p4051_p8 = por %p122_p6, %p121_p5 }
   0xe   : > { %s100_s27 = ssub.s32 %s3960_s18, %s5231_s23  ;;  %s105_s28 = sadd.s32 1, %s3944_s14 }
   0xf   : > { %s102_s29 = sor.u32 %s101_s24, %s100_s27  ;;  %p155_p10 = pnand %p2945_p7, %p154_p9 }
  0x10   : > { %p103_p11 = scmp.eq.s32.totalorder %s102_s29, 0 }
  0x11   : > { %158 = sbr.rel (%p155_p10) target bundleno = 454 (0x1c6), region = 32 }
  0x12   : > { %s4060_s30 = scalar_select %p103_p11, %s3944_s14, %s105_s28  }
  0x18   : > { %s175_s4 = sand.u32 1, %s3940_s13   ;;  %p178_p12 = scmp.lt.s32.totalorder %s3952_s16, 1 }
  0x19   : > { %s2946_s5 = sshll.u32 %s175_s4, 7  ;;  %p2949_p13 = scmp.ne.s32.totalorder %s3948_s15, 0 }
  0x1a   : > { %s179_s6 = scalar_select %p178_p12, %s3952_s16, 1 }
  0x1b   : > { %s4072_s11 = scalar_lea.vmem [#allocation4], %s2946_s5  ;;  %187 = sbr.rel (%p2949_p13) target bundleno = 72 (0x48), region = 36  ;;  %vm188_vm0 = vcmask (!%p2949_p13), 97280   ;;  %vm191_vm1 = vcmask (!%p2949_p13), 91136   ;;  %v3966_v3 = vmov (!%p2949_p13), 0.0  }
  0x1c   : > { %s3180_s7 = sshll.u32 %s179_s6, 8  ;;  %193 = vst.msk [vmem:[#allocation2 + $0x18] sm:$0xff] (!%p2949_p13), %vm188_vm0, %v3966_v3  ;;  %189 = vst.msk [vmem:[#allocation2] sm:$0xff] (!%p2949_p13), %vm188_vm0, %v3966_v3 }
  0x1d   : > { %s4070_s10 = scalar_lea.vmem %s5117_s0, %s3180_s7  ;;  %190 = vst.msk [vmem:[#allocation2 + $0x8] sm:$0xff] (!%p2949_p13), %vm188_vm0, %v3966_v3  ;;  %194 = vst.msk [vmem:[#allocation2 + $0x20] sm:$0xff] (!%p2949_p13), %vm188_vm0, %v3966_v3 }
  0x1e   : > { %v244_v0 = vld [vmem:[%s4070_s10] sm:$0xff] (!%p2949_p13)  ;;  %v245_v1 = vld [vmem:[%s4070_s10 + $0x8] sm:$0xff] (!%p2949_p13)  ;;  %v246_v2 = vld [vmem:[%s4070_s10 + $0x10] sm:$0xff] (!%p2949_p13)  ;;  %196 = vst.msk [vmem:[#allocation2 + $0x30] sm:$0xff] (!%p2949_p13), %vm188_vm0, %v3966_v3 }
  0x1f   : > { %197 = vst.msk [vmem:[#allocation2 + $0x38] sm:$0xff] (!%p2949_p13), %vm188_vm0, %v3966_v3  ;;  %199 = vst.msk [vmem:[#allocation2 + $0x48] sm:$0xff] (!%p2949_p13), %vm188_vm0, %v3966_v3  ;;  %v247_v4 = vld [vmem:[%s4070_s10 + $0x18] sm:$0xff] (!%p2949_p13)  ;;  %v248_v5 = vld [vmem:[%s4070_s10 + $0x20] sm:$0xff] (!%p2949_p13) }
  0x20   : > { %200 = vst.msk [vmem:[#allocation2 + $0x50] sm:$0xff] (!%p2949_p13), %vm188_vm0, %v3966_v3  ;;  %202 = vst.msk [vmem:[#allocation2 + $0x60] sm:$0xff] (!%p2949_p13), %vm188_vm0, %v3966_v3  ;;  %v249_v6 = vld [vmem:[%s4070_s10 + $0x28] sm:$0xff] (!%p2949_p13)  ;;  %v250_v7 = vld [vmem:[%s4070_s10 + $0x30] sm:$0xff] (!%p2949_p13) }
  0x21   : > { %203 = vst.msk [vmem:[#allocation2 + $0x68] sm:$0xff] (!%p2949_p13), %vm188_vm0, %v3966_v3  ;;  %205 = vst.msk [vmem:[#allocation2 + $0x78] sm:$0xff] (!%p2949_p13), %vm188_vm0, %v3966_v3  ;;  %v251_v8 = vld [vmem:[%s4070_s10 + $0x38] sm:$0xff] (!%p2949_p13)  ;;  %v252_v9 = vld [vmem:[%s4070_s10 + $0x40] sm:$0xff] (!%p2949_p13) }
  0x22   : > { %206 = vst.msk [vmem:[#allocation2 + $0x80] sm:$0xff] %vm188_vm0, %v3966_v3  ;;  %208 = vst.msk [vmem:[#allocation2 + $0x90] sm:$0xff] %vm188_vm0, %v3966_v3  ;;  %v253_v10 = vld [vmem:[%s4070_s10 + $0x48] sm:$0xff]  ;;  %v254_v11 = vld [vmem:[%s4070_s10 + $0x50] sm:$0xff] }
  0x23   : > { %209 = vst.msk [vmem:[#allocation2 + $0x98] sm:$0xff] %vm188_vm0, %v3966_v3  ;;  %211 = vst.msk [vmem:[#allocation2 + $0xa8] sm:$0xff] %vm188_vm0, %v3966_v3  ;;  %v255_v12 = vld [vmem:[%s4070_s10 + $0x58] sm:$0xff]  ;;  %v256_v13 = vld [vmem:[%s4070_s10 + $0x60] sm:$0xff] }
  0x24   : > { %212 = vst.msk [vmem:[#allocation2 + $0xb0] sm:$0xff] %vm188_vm0, %v3966_v3  ;;  %214 = vst.msk [vmem:[#allocation2 + $0xc0] sm:$0xff] %vm188_vm0, %v3966_v3  ;;  %v257_v14 = vld [vmem:[%s4070_s10 + $0x68] sm:$0xff]  ;;  %v258_v15 = vld [vmem:[%s4070_s10 + $0x70] sm:$0xff] }
  0x25   : > { %215 = vst.msk [vmem:[#allocation2 + $0xc8] sm:$0xff] %vm188_vm0, %v3966_v3  ;;  %217 = vst.msk [vmem:[#allocation2 + $0xd8] sm:$0xff] %vm188_vm0, %v3966_v3  ;;  %v259_v16 = vld [vmem:[%s4070_s10 + $0x78] sm:$0xff]  ;;  %v260_v17 = vld [vmem:[%s4070_s10 + $0x80] sm:$0xff] }
  0x26   : > { %218 = vst.msk [vmem:[#allocation2 + $0xe0] sm:$0xff] %vm188_vm0, %v3966_v3  ;;  %220 = vst.msk [vmem:[#allocation2 + $0xf0] sm:$0xff] %vm188_vm0, %v3966_v3  ;;  %v261_v18 = vld [vmem:[%s4070_s10 + $0x88] sm:$0xff]  ;;  %v262_v19 = vld [vmem:[%s4070_s10 + $0x90] sm:$0xff] }
  0x27   : > { %221 = vst.msk [vmem:[#allocation2 + $0xf8] sm:$0xff] %vm188_vm0, %v3966_v3  ;;  %223 = vst.msk [vmem:[#allocation2 + $0x108] sm:$0xff] %vm188_vm0, %v3966_v3  ;;  %v263_v20 = vld [vmem:[%s4070_s10 + $0x98] sm:$0xff]  ;;  %v264_v21 = vld [vmem:[%s4070_s10 + $0xa0] sm:$0xff] }
  0x28   : > { %224 = vst.msk [vmem:[#allocation2 + $0x110] sm:$0xff] %vm188_vm0, %v3966_v3  ;;  %226 = vst.msk [vmem:[#allocation2 + $0x120] sm:$0xff] %vm188_vm0, %v3966_v3  ;;  %v265_v22 = vld [vmem:[%s4070_s10 + $0xa8] sm:$0xff]  ;;  %v266_v23 = vld [vmem:[%s4070_s10 + $0xb0] sm:$0xff] }
  0x29   : > { %227 = vst.msk [vmem:[#allocation2 + $0x128] sm:$0xff] %vm188_vm0, %v3966_v3  ;;  %229 = vst.msk [vmem:[#allocation2 + $0x138] sm:$0xff] %vm188_vm0, %v3966_v3  ;;  %v267_v24 = vld [vmem:[%s4070_s10 + $0xb8] sm:$0xff]  ;;  %v268_v25 = vld [vmem:[%s4070_s10 + $0xc0] sm:$0xff] }
  0x2a   : > { %230 = vst.msk [vmem:[#allocation2 + $0x140] sm:$0xff] %vm188_vm0, %v3966_v3  ;;  %232 = vst.msk [vmem:[#allocation2 + $0x150] sm:$0xff] %vm188_vm0, %v3966_v3  ;;  %v269_v26 = vld [vmem:[%s4070_s10 + $0xc8] sm:$0xff]  ;;  %v270_v27 = vld [vmem:[%s4070_s10 + $0xd0] sm:$0xff] }
  0x2b   : > { %233 = vst.msk [vmem:[#allocation2 + $0x158] sm:$0xff] %vm188_vm0, %v3966_v3  ;;  %235 = vst.msk [vmem:[#allocation2 + $0x168] sm:$0xff] %vm188_vm0, %v3966_v3  ;;  %v271_v28 = vld [vmem:[%s4070_s10 + $0xd8] sm:$0xff]  ;;  %v272_v29 = vld [vmem:[%s4070_s10 + $0xe0] sm:$0xff] }
  0x2c   : > { %236 = vst.msk [vmem:[#allocation2 + $0x170] sm:$0xff] %vm188_vm0, %v3966_v3  ;;  %238 = vst.msk [vmem:[#allocation2 + $0x180] sm:$0xff] %vm188_vm0, %v3966_v3  ;;  %v273_v30 = vld [vmem:[%s4070_s10 + $0xe8] sm:$0xff]  ;;  %v274_v31 = vld [vmem:[%s4070_s10 + $0xf0] sm:$0xff] }
  0x2d   : > { %239 = vst.msk [vmem:[#allocation2 + $0x188] sm:$0xff] %vm188_vm0, %v3966_v3  ;;  %241 = vst.msk [vmem:[#allocation2 + $0x198] sm:$0xff] %vm188_vm0, %v3966_v3  ;;  %v275_v32 = vld [vmem:[%s4070_s10 + $0xf8] sm:$0xff] }
  0x2e   : > { %242 = vst.msk [vmem:[#allocation2 + $0x1a0] sm:$0xff] %vm188_vm0, %v3966_v3  ;;  %277 = vst.msk [vmem:[#allocation2 + $0x19] sm:$0xff] %vm188_vm0, %v244_v0 }
  0x2f   : > { %195 = vst.msk [vmem:[#allocation2 + $0x28] sm:$0x3] %vm191_vm1, %v3966_v3  ;;  %192 = vst.msk [vmem:[#allocation2 + $0x10] sm:$0x3] %vm191_vm1, %v3966_v3 }
  0x30   : > { %198 = vst.msk [vmem:[#allocation2 + $0x40] sm:$0x3] %vm191_vm1, %v3966_v3  ;;  %201 = vst.msk [vmem:[#allocation2 + $0x58] sm:$0x3] %vm191_vm1, %v3966_v3 }
  0x31   : > { %204 = vst.msk [vmem:[#allocation2 + $0x70] sm:$0x3] %vm191_vm1, %v3966_v3  ;;  %207 = vst.msk [vmem:[#allocation2 + $0x88] sm:$0x3] %vm191_vm1, %v3966_v3 }
  0x32   : > { %210 = vst.msk [vmem:[#allocation2 + $0xa0] sm:$0x3] %vm191_vm1, %v3966_v3  ;;  %213 = vst.msk [vmem:[#allocation2 + $0xb8] sm:$0x3] %vm191_vm1, %v3966_v3 }
  0x33   : > { %216 = vst.msk [vmem:[#allocation2 + $0xd0] sm:$0x3] %vm191_vm1, %v3966_v3  ;;  %219 = vst.msk [vmem:[#allocation2 + $0xe8] sm:$0x3] %vm191_vm1, %v3966_v3 }
  0x34   : > { %222 = vst.msk [vmem:[#allocation2 + $0x100] sm:$0x3] %vm191_vm1, %v3966_v3  ;;  %225 = vst.msk [vmem:[#allocation2 + $0x118] sm:$0x3] %vm191_vm1, %v3966_v3 }
  0x35   : > { %228 = vst.msk [vmem:[#allocation2 + $0x130] sm:$0x3] %vm191_vm1, %v3966_v3  ;;  %231 = vst.msk [vmem:[#allocation2 + $0x148] sm:$0x3] %vm191_vm1, %v3966_v3 }
  0x36   : > { %234 = vst.msk [vmem:[#allocation2 + $0x160] sm:$0x3] %vm191_vm1, %v3966_v3  ;;  %237 = vst.msk [vmem:[#allocation2 + $0x178] sm:$0x3] %vm191_vm1, %v3966_v3 }
  0x37   : > { %240 = vst.msk [vmem:[#allocation2 + $0x190] sm:$0x3] %vm191_vm1, %v3966_v3  ;;  %243 = vst.msk [vmem:[#allocation2 + $0x1a8] sm:$0x3] %vm191_vm1, %v3966_v3 }
  0x38   : > { %278 = vst.msk [vmem:[#allocation2 + $0x21] sm:$0xff] %vm188_vm0, %v245_v1  ;;  %279 = vst.msk [vmem:[#allocation2 + $0x31] sm:$0xff] %vm188_vm0, %v246_v2 }
  0x39   : > { %280 = vst.msk [vmem:[#allocation2 + $0x39] sm:$0xff] %vm188_vm0, %v247_v4  ;;  %281 = vst.msk [vmem:[#allocation2 + $0x49] sm:$0xff] %vm188_vm0, %v248_v5 }
  0x3a   : > { %282 = vst.msk [vmem:[#allocation2 + $0x51] sm:$0xff] %vm188_vm0, %v249_v6  ;;  %283 = vst.msk [vmem:[#allocation2 + $0x61] sm:$0xff] %vm188_vm0, %v250_v7 }
  0x3b   : > { %284 = vst.msk [vmem:[#allocation2 + $0x69] sm:$0xff] %vm188_vm0, %v251_v8  ;;  %285 = vst.msk [vmem:[#allocation2 + $0x79] sm:$0xff] %vm188_vm0, %v252_v9 }
  0x3c   : > { %286 = vst.msk [vmem:[#allocation2 + $0x81] sm:$0xff] %vm188_vm0, %v253_v10  ;;  %287 = vst.msk [vmem:[#allocation2 + $0x91] sm:$0xff] %vm188_vm0, %v254_v11 }
  0x3d   : > { %288 = vst.msk [vmem:[#allocation2 + $0x99] sm:$0xff] %vm188_vm0, %v255_v12  ;;  %289 = vst.msk [vmem:[#allocation2 + $0xa9] sm:$0xff] %vm188_vm0, %v256_v13 }
  0x3e   : > { %290 = vst.msk [vmem:[#allocation2 + $0xb1] sm:$0xff] %vm188_vm0, %v257_v14  ;;  %291 = vst.msk [vmem:[#allocation2 + $0xc1] sm:$0xff] %vm188_vm0, %v258_v15 }
  0x3f   : > { %292 = vst.msk [vmem:[#allocation2 + $0xc9] sm:$0xff] %vm188_vm0, %v259_v16  ;;  %293 = vst.msk [vmem:[#allocation2 + $0xd9] sm:$0xff] %vm188_vm0, %v260_v17 }
  0x40   : > { %294 = vst.msk [vmem:[#allocation2 + $0xe1] sm:$0xff] %vm188_vm0, %v261_v18  ;;  %295 = vst.msk [vmem:[#allocation2 + $0xf1] sm:$0xff] %vm188_vm0, %v262_v19 }
  0x41   : > { %296 = vst.msk [vmem:[#allocation2 + $0xf9] sm:$0xff] %vm188_vm0, %v263_v20  ;;  %297 = vst.msk [vmem:[#allocation2 + $0x109] sm:$0xff] %vm188_vm0, %v264_v21 }
  0x42   : > { %298 = vst.msk [vmem:[#allocation2 + $0x111] sm:$0xff] %vm188_vm0, %v265_v22  ;;  %299 = vst.msk [vmem:[#allocation2 + $0x121] sm:$0xff] %vm188_vm0, %v266_v23 }
  0x43   : > { %300 = vst.msk [vmem:[#allocation2 + $0x129] sm:$0xff] %vm188_vm0, %v267_v24  ;;  %301 = vst.msk [vmem:[#allocation2 + $0x139] sm:$0xff] %vm188_vm0, %v268_v25 }
  0x44   : > { %302 = vst.msk [vmem:[#allocation2 + $0x141] sm:$0xff] %vm188_vm0, %v269_v26  ;;  %303 = vst.msk [vmem:[#allocation2 + $0x151] sm:$0xff] %vm188_vm0, %v270_v27 }
  0x45   : > { %304 = vst.msk [vmem:[#allocation2 + $0x159] sm:$0xff] %vm188_vm0, %v271_v28  ;;  %305 = vst.msk [vmem:[#allocation2 + $0x169] sm:$0xff] %vm188_vm0, %v272_v29 }
  0x46   : > { %306 = vst.msk [vmem:[#allocation2 + $0x171] sm:$0xff] %vm188_vm0, %v273_v30  ;;  %307 = vst.msk [vmem:[#allocation2 + $0x181] sm:$0xff] %vm188_vm0, %v274_v31 }
  0x47   : > { %308 = vst.msk [vmem:[#allocation2 + $0x189] sm:$0xff] %vm188_vm0, %v275_v32 }
  0x48 PF: > { %v375_v33 = vld [vmem:[%s5118_s1] sm:$0xff]  ;;  %v376_v34 = vld [vmem:[%s5118_s1 + $0x8] sm:$0xf]  ;;  %vm426_vm2 = vcmask 1043456   ;;  %vm3967_vm3 = vmmov 1   ;;  %s2952_s7 = smul.u32 192, %s3948_s15 }
  0x49   : > { %v3053_v35 = vld [vmem:[%s5118_s1 + $0x40] sm:$0xff]  ;;  %v3595_v36 = vpack.c.bf16 %v376_v34, %v375_v33  ;;  %vm4202_vm4 = vmpackc.low %vm426_vm2, %vm3967_vm3  ;;  %v3054_v38 = vld [vmem:[%s5118_s1 + $0x48] sm:$0xf]  ;;  %vm377_vm5 = vcmask 97280   ;;  %vm631_vm6 = vcmask 1046528   ;;  %vm903_vm7 = vcmask 1045504  }
  0x4a   : > { %v2970_v39 = vld [vmem:[%s5118_s1 + $0x10] sm:$0xff]  ;;  %v4213_v40 = vpack.c.bf16 %v3054_v38, %v3053_v35  ;;  %v2971_v41 = vld [vmem:[%s5118_s1 + $0x18] sm:$0xf]  ;;  %s4231_s29 = scalar_lea.vmem [#allocation2], %s2952_s7  ;;  %v3117_v51 = vld [vmem:[%s5118_s1 + $0x60] sm:$0xff]  ;;  %s3175_s28 = sshll.u32 %s3948_s15, 4 }
  0x4b   : > { %v3072_v42 = vld [vmem:[%s5118_s1 + $0x50] sm:$0xff]  ;;  %v3073_v43 = vld [vmem:[%s5118_s1 + $0x58] sm:$0xf]  ;;  %3597 = vmatprep.subr.msk.bf16.mxu1 %vm4202_vm4, %v3595_v36  ;;  %v3601_v44 = vpack.c.bf16 %v2971_v41, %v2970_v39  ;;  %v3118_v55 = vld [vmem:[%s5118_s1 + $0x68] sm:$0xf]  ;;  %s3176_s5 = sshll.u32 %s3952_s16, 5 }
  0x4c   : > { %5159 = vst [vmem:[#allocation7_spill] sm:$0xff] %v4213_v40  ;;  %v3625_v45 = vpack.c.bf16 %v3073_v43, %v3072_v42  ;;  %3600 = vmatpush3.bf16.msk.msra.mxu1 %vm4202_vm4, %v3595_v36  ;;  %3621 = vmatprep.subr.msk.bf16.mxu0 %vm4202_vm4, %v4213_v40  ;;  %v4315_v7 = vpack.c.bf16 %v3118_v55, %v3117_v51  ;;  %v2989_v20 = vld [vmem:[%s5118_s1 + $0x20] sm:$0xff]  ;;  %v2990_v21 = vld [vmem:[%s5118_s1 + $0x28] sm:$0xf]  ;;  %v3136_v29 = vld [vmem:[%s5118_s1 + $0x70] sm:$0xff]  ;;  %s2852_s6 = sadd.s32 %s3176_s5, %s3175_s28  ;;  %s2855_s16 = sshll.u32 %s4072_s11, 4  ;;  %s5059_s16 = int_to_ptr.vmem [resolvable:$true] %s2855_s16 }
  0x4d   : > { %3624 = vmatpush3.bf16.msk.msra.mxu0 %vm4202_vm4, %v4213_v40  ;;  %3603 = vmatprep.subr.msk.bf16.mxu1 %vm4202_vm4, %v3601_v44  ;;  %v4379_v24 = vpack.c.bf16 %v2990_v21, %v2989_v20  ;;  %v3137_v30 = vld [vmem:[%s5118_s1 + $0x78] sm:$0xf]  ;;  %v3034_v40 = vld [vmem:[%s5118_s1 + $0x30] sm:$0xff]  ;;  %s3177_s15 = sshll.u32 %s2852_s6, 7  ;;  %s5065_s10 = scalar_lea.sflag [#allocation5], %s175_s4 }
  0x4e   : > { %v4234_v46 = vld [vmem:[%s4231_s29] sm:$0xff]  ;;  %v4237_v47 = vld [vmem:[%s4231_s29 + $0x8] sm:$0xff]  ;;  %v4240_v48 = vld [vmem:[%s4231_s29 + $0x18] sm:$0xff]  ;;  %3627 = vmatprep.subr.msk.bf16.mxu0 %vm4202_vm4, %v3625_v45  ;;  %v4448_v55 = vpack.c.bf16 %v3137_v30, %v3136_v29  ;;  %s5057_s9 = scalar_lea.hbm %s5120_s3, %s3177_s15  ;;  %s3870_s20 = scalar_lea.vmem %s5059_s16, 2048 }
  0x4f   : > { %5160 = vst [vmem:[#allocation8_spill] sm:$0xff] %v4234_v46  ;;  %5161 = vst [vmem:[#allocation9_spill] sm:$0xff] %v4237_v47  ;;  %3347 = vmatprep.mubr.msk.f32.mxu1 %vm377_vm5, %v4234_v46  ;;  %v4248_v49 = vld [vmem:[%s4231_s29 + $0x20] sm:$0xff]  ;;  %v4251_v50 = vld [vmem:[%s4231_s29 + $0x30] sm:$0xff]  ;;  %v1457_v52 = vrot.slane %v4240_v48, 1  ;;  %v909_v17 = vrot.slane %v4240_v48, 2  ;;  %p3871_p0 = scmp.ne.s32.totalorder %s5059_s16, %s3870_s20 }
  0x50   : > { %5162 = vst [vmem:[#allocation10_spill] sm:$0xff] %v4240_v48  ;;  %5163 = vst [vmem:[#allocation11_spill] sm:$0xff] %v4248_v49  ;;  %v4260_v53 = vrot.slane %v4248_v49, 1  ;;  %v4263_v54 = vld [vmem:[%s4231_s29 + $0x28] sm:$0x3]  ;;  %3348 = vmatmul.mubr.msk.f32.vlgmr.msra.gmra.mrb[0].mxu1 %vm377_vm5, %v4237_v47  ;;  %v4274_v57 = vld [vmem:[%s4231_s29 + $0x38] sm:$0xff] }
  0x51   : > { %v1460_v56 = vrot.slane %v4263_v54, 1  ;;  %v1462_v58 = vrot.slane %v4251_v50, 1  ;;  %v4278_v59 = vld [vmem:[%s4231_s29 + $0x40] sm:$0x3]  ;;  %3606 = vmatpush3.bf16.msk.msra.mxu1 %vm4202_vm4, %v3601_v44  ;;  %3350 = vmatprep.mubr.msk.f32.mxu1 %vm377_vm5, %v4240_v48  ;;  %v4289_v61 = vrot.slane %v4274_v57, 1  ;;  %v4293_v63 = vld [vmem:[%s4231_s29 + $0x48] sm:$0xff]  ;;  %p3872_p1 = pnand %p3871_p0, %p4042_p3 }
  0x52   : > { %v4282_v60 = vsel %vm631_vm6, %v1457_v52, %v4260_v53  ;;  %v1465_v62 = vrot.slane %v4278_v59, 1  ;;  %5164 = vst [vmem:[#allocation12_spill] sm:$0xff] %v4293_v63  ;;  %v4296_v0 = vld [vmem:[%s4231_s29 + $0x50] sm:$0xff]  ;;  %v1467_v2 = vrot.slane %v4293_v63, 1  ;;  %v4307_v4 = vld [vmem:[%s4231_s29 + $0x58] sm:$0x3]  ;;  %3609 = vmatprep.subr.msk.bf16.mxu1 %vm4202_vm4, %v4379_v24 }
  0x53   : > { %5165 = vst [vmem:[#allocation13_spill] sm:$0xff] %v4296_v0  ;;  %3459 = vmatprep.mubr.msk.f32.mxu0 %vm377_vm5, %v4282_v60  ;;  %v1461_v1 = vsel %vm631_vm6, %v4260_v53, %v1460_v56  ;;  %v4304_v3 = vrot.slane %v4296_v0, 1  ;;  %v4310_v5 = vld [vmem:[%s4231_s29 + $0x60] sm:$0xff]  ;;  %v4313_v6 = vld [vmem:[%s4231_s29 + $0x68] sm:$0xff]  ;;  %v4320_v8 = vsel %vm631_vm6, %v1462_v58, %v4289_v61  ;;  %v1470_v10 = vrot.slane %v4307_v4, 1  ;;  %v4392_v28 = vld [vmem:[%s4231_s29 + $0x78] sm:$0xff]  ;;  %p3873_p2 = pneg %p3872_p1 }
  0x54   : > { %5166 = vst [vmem:[#allocation14_spill] sm:$0xff] %v4310_v5  ;;  %5167 = vst [vmem:[#allocation15_spill] sm:$0xff] %v4313_v6  ;;  %3460 = vmatmul.mubr.msk.f32.vlgmr.msra.gmra.mrb[0].mxu0 %vm377_vm5, %v1461_v1  ;;  %3351 = vmatmul.mubr.msk.f32.gmra.mrb[2].mxu1 %vm377_vm5, %v4248_v49  ;;  %v1466_v9 = vsel %vm631_vm6, %v4289_v61, %v1465_v62  ;;  %v1472_v12 = vrot.slane %v4310_v5, 1  ;;  %v4339_v13 = vrot.slane %v4313_v6, 1  ;;  %v4342_v14 = vld [vmem:[%s4231_s29 + $0x70] sm:$0x3] }
  0x55   : > { %3630 = vmatpush3.bf16.msk.msra.mxu0 %vm4202_vm4, %v3625_v45  ;;  %3462 = vmatprep.mubr.msk.f32.mxu0 %vm377_vm5, %v4320_v8  ;;  %v4335_v11 = vsel %vm631_vm6, %v1467_v2, %v4304_v3  ;;  %v1471_v15 = vsel %vm631_vm6, %v4304_v3, %v1470_v10  ;;  %v1475_v16 = vrot.slane %v4342_v14, 1  ;;  %v4357_v18 = vrot.slane %v4248_v49, 2  ;;  %v4421_v39 = vld [vmem:[%s4231_s29 + $0x80] sm:$0xff]  ;;  %v4424_v41 = vld [vmem:[%s4231_s29 + $0x90] sm:$0xff]  ;;  %v4427_v42 = vld [vmem:[%s4231_s29 + $0x98] sm:$0xff]  ;;  %s3968_s21 = smov [#allocation4]  }
  0x56   : > { %3353 = vmatprep.mubr.msk.f32.mxu1 %vm377_vm5, %v4251_v50  ;;  %3633 = vmatprep.subr.msk.bf16.mxu0 %vm4202_vm4, %v4315_v7  ;;  %v4363_v19 = vsel %vm631_vm6, %v1472_v12, %v4339_v13  ;;  %v1731_v22 = vrot.slane %v4263_v54, 2  ;;  %v914_v26 = vrot.slane %v4251_v50, 2  ;;  %v4389_v27 = vrot.slane %v4274_v57, 2  ;;  %5170 = vst [vmem:[#allocation18_spill] sm:$0xff] %v4421_v39  ;;  %5171 = vst [vmem:[#allocation19_spill] sm:$0xff] %v4427_v42  ;;  %v4437_v45 = vld [vmem:[%s4231_s29 + $0xa8] sm:$0xff] }
  0x57   : > { %5168 = vst [vmem:[#allocation16_spill] sm:$0xff] %v4357_v18  ;;  %v1476_v23 = vsel %vm631_vm6, %v4339_v13, %v1475_v16  ;;  %v4385_v25 = vsel %vm903_vm7, %v909_v17, %v4357_v18  ;;  %v919_v31 = vrot.slane %v4293_v63, 2  ;;  %v4406_v32 = vrot.slane %v4296_v0, 2  ;;  %v4440_v51 = vld [vmem:[%s4231_s29 + $0xb0] sm:$0xff]  ;;  %v4446_v54 = vld [vmem:[%s4231_s29 + $0x88] sm:$0x3] }
  0x58   : > { %3463 = vmatmul.mubr.msk.f32.gmra.mrb[2].mxu0 %vm377_vm5, %v1466_v9  ;;  %3354 = vmatmul.mubr.msk.f32.gmra.mrb[4].mxu1 %vm377_vm5, %v4274_v57  ;;  %5169 = vst [vmem:[#allocation17_spill] sm:$0xff] %v4385_v25  ;;  %v1732_v33 = vsel %vm903_vm7, %v4357_v18, %v1731_v22  ;;  %v1736_v34 = vrot.slane %v4278_v59, 2  ;;  %v632_v35 = vrot.slane %v4234_v46, 1  ;;  %v633_v36 = vrot.slane %v4237_v47, 1  ;;  %5173 = vst [vmem:[#allocation21_spill] sm:$0xff] %v4440_v51  ;;  %s3874_s24 = sshll.u32 %s3968_s21, 4  ;;  %s3875_s24 = int_to_ptr.vmem [resolvable:$false] %s3874_s24 }
  0x59   : > { %3465 = vmatprep.mubr.msk.f32.mxu0 %vm377_vm5, %v4335_v11  ;;  %3356 = vmatprep.mubr.msk.f32.mxu1 %vm377_vm5, %v4293_v63  ;;  %v924_v38 = vrot.slane %v4310_v5, 2  ;;  %v4430_v43 = vrot.slane %v4313_v6, 2  ;;  %v4434_v44 = vsel %vm903_vm7, %v914_v26, %v4389_v27  ;;  %v4443_v52 = vld [vmem:[%s4231_s29 + $0x10] sm:$0x3]  ;;  %v929_v56 = vrot.slane %v4392_v28, 2  ;;  %p3877_p4 = scmp.lt.s32.totalorder %s5059_s16, %s3875_s24 }
  0x5a   : > { %5172 = vst [vmem:[#allocation20_spill] sm:$0xff] %v4434_v44  ;;  %5174 = vst [vmem:[#allocation22_spill] sm:$0xff] %v4443_v52  ;;  %v4453_v58 = vrot.slane %v4421_v39, 1  ;;  %v4456_v59 = vrot.slane %v4421_v39, 2  ;;  %v934_v62 = vrot.slane %v4424_v41, 2  ;;  %v1737_v2 = vsel %vm903_vm7, %v4389_v27, %v1736_v34 }
  0x5b   : > { %v4460_v1 = vld [vmem:[%s4231_s29 + $0x28] sm:$0x3]  ;;  %v4470_v9 = vrot.slane %v4427_v42, 2  ;;  %v4474_v10 = vsel %vm903_vm7, %v919_v31, %v4406_v32  ;;  %v1741_v12 = vrot.slane %v4307_v4, 2  ;;  %v939_v16 = vrot.slane %v4437_v45, 2 }
  0x5c   : > { %3466 = vmatmul.mubr.msk.f32.gmra.mrb[4].mxu0 %vm377_vm5, %v1471_v15  ;;  %3357 = vmatmul.mubr.msk.f32.gmra.mrb[6].mxu1 %vm377_vm5, %v4296_v0  ;;  %5175 = vst [vmem:[#allocation23_spill] sm:$0xff] %v4460_v1  ;;  %5176 = vst [vmem:[#allocation24_spill] sm:$0xff] %v4474_v10  ;;  %v4478_v15 = vld [vmem:[%s4231_s29 + $0xa0] sm:$0x3]  ;;  %v4489_v17 = vrot.slane %v4440_v51, 2  ;;  %v1746_v20 = vrot.slane %v4342_v14, 2  ;;  %v634_v22 = vsel %vm631_vm6, %v632_v35, %v633_v36 }
  0x5d   : > { %3468 = vmatprep.mubr.msk.f32.mxu0 %vm377_vm5, %v4363_v19  ;;  %3359 = vmatprep.mubr.msk.f32.mxu1 %vm377_vm5, %v4310_v5  ;;  %v635_v4 = vrot.slane %v4443_v52, 1  ;;  %v4494_v21 = vrot.slane %v4427_v42, 1  ;;  %v4499_v26 = vld [vmem:[%s4231_s29 + $0xb8] sm:$0x3]  ;;  %v4509_v14 = vrot.slane %v4440_v51, 1  ;;  %v640_v30 = vrot.slane %v4460_v1, 1 }
  0x5e   : > { %v4502_v29 = vld [vmem:[%s4231_s29 + $0x58] sm:$0x3]  ;;  %v1756_v31 = vrot.slane %v4478_v15, 2  ;;  %v4515_v34 = vld [vmem:[%s4231_s29 + $0x40] sm:$0x3]  ;;  %v1742_v35 = vsel %vm903_vm7, %v4406_v32, %v1741_v12  ;;  %v4529_v49 = vsel %vm903_vm7, %v929_v56, %v4456_v59  ;;  %v4548_v56 = vsel %vm903_vm7, %v934_v62, %v4470_v9 }
  0x5f   : > { %v636_v12 = vsel %vm631_vm6, %v633_v36, %v635_v4  ;;  %v4552_v48 = vsel %vm903_vm7, %v939_v16, %v4489_v17  ;;  %v4561_v36 = vld [vmem:[%s4231_s29 + $0x70] sm:$0x3]  ;;  %v2284_v18 = vrot.slane %v4515_v34, 1  ;;  %v4584_v16 = vld [vmem:[%s4231_s29 + $0xe0] sm:$0xff]  ;;  %v3110_v52 = vld [vmem:[%s4231_s29 + $0xb8] sm:$0x3] }
  0x60   : > { %3469 = vmatmul.mubr.msk.f32.gmra.mrb[6].mxu0 %vm377_vm5, %v1476_v23  ;;  %3360 = vmatmul.mubr.msk.f32.gmra.mrb[8].mxu1 %vm377_vm5, %v4313_v6  ;;  %v1751_v23 = vrot.slane %v4446_v54, 2  ;;  %v4577_v1 = vsel %vm903_vm7, %v4470_v9, %v1756_v31  ;;  %v3107_v6 = vld [vmem:[%s4231_s29 + $0xa0] sm:$0x3]  ;;  %v3116_v47 = vld [vmem:[%s4231_s29 + $0xe8] sm:$0x3]  ;;  %v2309_v46 = vrot.slane %v3110_v52, 1 }
  0x61   : > { %3487 = vmatprep.mubr.msk.f32.mxu0 %vm377_vm5, %v4385_v25  ;;  %3362 = vmatprep.mubr.msk.f32.mxu1 %vm377_vm5, %v4392_v28  ;;  %v3104_v25 = vld [vmem:[%s4231_s29 + $0x88] sm:$0x3]  ;;  %v4597_v31 = vsel %vm631_vm6, %v4289_v61, %v2284_v18 }
  0x62   : > { %v1752_v62 = vsel %vm903_vm7, %v4456_v59, %v1751_v23  ;;  %5180 = vst [vmem:[#allocation28_spill] sm:$0xff] %v4597_v31  ;;  %v2304_v31 = vrot.slane %v3107_v6, 1 }
  0x64   : > { %3488 = vmatmul.mubr.msk.f32.vlgmr.msra.gmra.mrb[0].mxu0 %vm377_vm5, %v1732_v33  ;;  %3363 = vmatmul.mubr.msk.f32.gmra.mrb[10].mxu1 %vm377_vm5, %v4421_v39  ;;  %v641_v39 = vsel %vm631_vm6, %v4260_v53, %v640_v30  ;;  %v2317_v30 = vrot.slane %v4584_v16, 1 }
  0x65   : > { %3636 = vmatpush3.bf16.msk.msra.mxu0 %vm4202_vm4, %v4315_v7  ;;  %v4481_v7 = vld [vmem:[%s4231_s29 + $0x40] sm:$0x3]  ;;  %3490 = vmatprep.mubr.msk.f32.mxu0 %vm377_vm5, %v4434_v44 }
  0x66   : > { %5177 = vst [vmem:[#allocation25_spill] sm:$0xff] %v4481_v7  ;;  %3365 = vmatprep.mubr.msk.f32.mxu1 %vm377_vm5, %v4424_v41  ;;  %3639 = vmatprep.subr.msk.bf16.mxu0 %vm4202_vm4, %v4448_v55  ;;  %v645_v33 = vrot.slane %v4481_v7, 1  ;;  %v4533_v44 = vld [vmem:[%s4231_s29 + $0xc0] sm:$0xff]  ;;  %v4568_v7 = vld [vmem:[%s4231_s29 + $0xd8] sm:$0xff] }
  0x67   : > { %v2316_v53 = vrot.slane %v4568_v7, 1  ;;  %v2587_v5 = vrot.slane %v4568_v7, 2 }
  0x68   : > { %3491 = vmatmul.mubr.msk.f32.gmra.mrb[2].mxu0 %vm377_vm5, %v1737_v2  ;;  %3366 = vmatmul.mubr.msk.f32.gmra.mrb[12].mxu1 %vm377_vm5, %v4427_v42  ;;  %v4525_v2 = vsel %vm903_vm7, %v924_v38, %v4430_v43  ;;  %v4536_v42 = vld [vmem:[%s4231_s29 + $0xc8] sm:$0xff]  ;;  %v1747_v38 = vsel %vm903_vm7, %v4430_v43, %v1746_v20  ;;  %v3035_v20 = vld [vmem:[%s5118_s1 + $0x38] sm:$0xf]  ;;  %v4581_v23 = vsel %vm631_vm6, %v4289_v61, %v645_v33  ;;  %v2294_v33 = vrot.slane %v4561_v36, 1 }
  0x69   : > { %3493 = vmatprep.mubr.msk.f32.mxu0 %vm377_vm5, %v4474_v10  ;;  %5178 = vst [vmem:[#allocation26_spill] sm:$0xff] %v4525_v2  ;;  %5179 = vst [vmem:[#allocation27_spill] sm:$0xff] %v4536_v42  ;;  %v4539_v10 = vld [vmem:[%s4231_s29 + $0x58] sm:$0x3]  ;;  %3368 = vmatprep.mubr.msk.f32.mxu1 %vm377_vm5, %v4437_v45  ;;  %v4614_v61 = vpack.c.bf16 %v3035_v20, %v3034_v40  ;;  %v4632_v20 = vsel %vm631_vm6, %v4494_v21, %v2304_v31 }
  0x6a   : > { %v2289_v4 = vrot.slane %v4539_v10, 1  ;;  %v4618_v18 = vsel %vm631_vm6, %v4339_v13, %v2294_v33  ;;  %v2560_v33 = vrot.slane %v4539_v10, 2 }
  0x6c   : > { %3494 = vmatmul.mubr.msk.f32.gmra.mrb[4].mxu0 %vm377_vm5, %v1742_v35  ;;  %3369 = vmatmul.mubr.msk.f32.gmra.mrb[14].mxu1 %vm377_vm5, %v4440_v51  ;;  %v3113_v35 = vld [vmem:[%s4231_s29 + $0xd0] sm:$0x3]  ;;  %v4604_v51 = vrot.slane %v4536_v42, 2  ;;  %v4611_v0 = vsel %vm631_vm6, %v4304_v3, %v2289_v4  ;;  %v2319_v4 = vrot.slane %v3116_v47, 1 }
  0x6d   : > { %3496 = vmatprep.mubr.msk.f32.mxu0 %vm377_vm5, %v4525_v2  ;;  %3375 = vmatprep.mubr.msk.f32.mxu1 %vm377_vm5, %v634_v22  ;;  %v4607_v2 = vrot.slane %v4536_v42, 1  ;;  %v2299_v22 = vrot.slane %v3104_v25, 1  ;;  %v2588_v42 = vrot.slane %v4584_v16, 2  ;;  %v2314_v63 = vrot.slane %v3113_v35, 1 }
  0x6f   : > { %v4628_v40 = vsel %vm631_vm6, %v4453_v58, %v2299_v22  ;;  %v4648_v31 = vsel %vm631_vm6, %v4607_v2, %v2314_v63  ;;  %v5181_v22 = vrot.slane %v4446_v54, 1  ;;  %v3033_v54 = vld [vmem:[%s4231_s29 + $0xd0] sm:$0x3] }
  0x70   : > { %3497 = vmatmul.mubr.msk.f32.gmra.mrb[6].mxu0 %vm377_vm5, %v1747_v38  ;;  %3376 = vmatmul.mubr.msk.f32.vlgmr.msra.gmra.mrb[0].mxu1 %vm377_vm5, %v636_v12  ;;  %v4635_v38 = vsel %vm631_vm6, %v2316_v53, %v2317_v30  ;;  %v4644_v12 = vsel %vm631_vm6, %v4509_v14, %v2309_v46  ;;  %v2555_v53 = vrot.slane %v4515_v34, 2  ;;  %v2570_v46 = vrot.slane %v3104_v25, 2 }
  0x71   : > { %3499 = vmatprep.mubr.msk.f32.mxu0 %vm377_vm5, %v4529_v49  ;;  %3612 = vmatpush3.bf16.msk.msra.mxu1 %vm4202_vm4, %v4379_v24  ;;  %v4656_v24 = vsel %vm631_vm6, %v2317_v30, %v2319_v4  ;;  %v4663_v63 = vsel %vm631_vm6, %v4453_v58, %v5181_v22  ;;  %v4672_v34 = vsel %vm903_vm7, %v4406_v32, %v2560_v33  ;;  %v2575_v30 = vrot.slane %v3107_v6, 2 }
  0x72   : > { %3378 = vmatprep.mubr.msk.f32.mxu1 %vm377_vm5, %v4282_v60  ;;  %3615 = vmatprep.subr.msk.bf16.mxu1 %vm4202_vm4, %v4614_v61  ;;  %v2565_v60 = vrot.slane %v4561_v36, 2  ;;  %v4668_v10 = vsel %vm903_vm7, %v4389_v27, %v2555_v53  ;;  %v1485_v25 = vrot.slane %v4478_v15, 1  ;;  %v2580_v4 = vrot.slane %v3110_v52, 2 }
  0x73   : > { %v1490_v53 = vrot.slane %v4499_v26, 1  ;;  %v4692_v6 = vsel %vm903_vm7, %v4470_v9, %v2575_v30  ;;  %v2585_v15 = vrot.slane %v3113_v35, 2  ;;  %v1495_v33 = vrot.slane %v3033_v54, 1 }
  0x74   : > { %3500 = vmatmul.mubr.msk.f32.gmra.mrb[8].mxu0 %vm377_vm5, %v1752_v62  ;;  %3379 = vmatmul.mubr.msk.f32.gmra.mrb[2].mxu1 %vm377_vm5, %v641_v39  ;;  %v4681_v36 = vsel %vm903_vm7, %v4430_v43, %v2565_v60  ;;  %v4685_v62 = vsel %vm903_vm7, %v4456_v59, %v2570_v46  ;;  %v4696_v39 = vsel %vm631_vm6, %v4494_v21, %v1485_v25  ;;  %v4699_v60 = vld [vmem:[%s4231_s29 + $0x70] sm:$0x3]  ;;  %v2590_v30 = vrot.slane %v3116_v47, 2 }
  0x75   : > { %3502 = vmatprep.mubr.msk.f32.mxu0 %vm377_vm5, %v4548_v56  ;;  %3381 = vmatprep.mubr.msk.f32.mxu1 %vm377_vm5, %v4320_v8  ;;  %v4703_v52 = vsel %vm903_vm7, %v4489_v17, %v2580_v4  ;;  %v4707_v46 = vsel %vm631_vm6, %v4509_v14, %v1490_v53  ;;  %v4710_v22 = vsel %vm903_vm7, %v2587_v5, %v2588_v42  ;;  %v5186_v5 = vrot.slane %v4499_v26, 2 }
  0x76   : > { %5182 = vst [vmem:[#allocation29_spill] sm:$0xff] %v4707_v46  ;;  %5183 = vst [vmem:[#allocation30_spill] sm:$0xff] %v4710_v22  ;;  %v4716_v35 = vsel %vm903_vm7, %v4604_v51, %v2585_v15  ;;  %v4720_v25 = vsel %vm631_vm6, %v4607_v2, %v1495_v33  ;;  %v4731_v4 = vsel %vm903_vm7, %v2588_v42, %v2590_v30  ;;  %v5188_v53 = vrot.slane %v4502_v29, 1  ;;  %v4748_v33 = vld [vmem:[%s4231_s29 + $0x88] sm:$0x3] }
  0x77   : > { %5184 = vst [vmem:[#allocation31_spill] sm:$0xff] %v4716_v35  ;;  %5185 = vst [vmem:[#allocation32_spill] sm:$0xff] %v4720_v25  ;;  %v1762_v47 = vsel %vm903_vm7, %v4489_v17, %v5186_v5  ;;  %v5189_v15 = vrot.slane %v4533_v44, 2  ;;  %v657_v42 = vrot.slane %v4392_v28, 1  ;;  %v660_v5 = vrot.slane %v4748_v33, 1  ;;  %v5195_v25 = vld [vmem:[#allocation14_spill] sm:$0xff] }
  0x78   : > { %3503 = vmatmul.mubr.msk.f32.gmra.mrb[10].mxu0 %vm377_vm5, %v4577_v1  ;;  %3382 = vmatmul.mubr.msk.f32.gmra.mrb[4].mxu1 %vm377_vm5, %v4581_v23  ;;  %v1766_v1 = vrot.slane %v3033_v54, 2  ;;  %5187 = vst [vmem:[#allocation33_spill] sm:$0xff] %v4731_v4  ;;  %v651_v23 = vsel %vm631_vm6, %v4304_v3, %v5188_v53  ;;  %v655_v54 = vrot.slane %v4699_v60, 1  ;;  %v662_v53 = vrot.slane %v4424_v41, 1  ;;  %v5193_v4 = vld [vmem:[#allocation9_spill] sm:$0xff]  ;;  %v5198_v35 = vld [vmem:[#allocation23_spill] sm:$0xff] }
  0x79   : > { %3505 = vmatprep.mubr.msk.f32.mxu0 %vm377_vm5, %v4552_v48  ;;  %3384 = vmatprep.mubr.msk.f32.mxu1 %vm377_vm5, %v4335_v11  ;;  %v4743_v26 = vsel %vm903_vm7, %v5189_v15, %v4604_v51  ;;  %v905_v22 = vrot.slane %v5193_v4, 2  ;;  %v5196_v4 = vld [vmem:[#allocation22_spill] sm:$0xff] }
  0x7a   : > { %5190 = vst [vmem:[#allocation34_spill] sm:$0xff] %v4743_v26  ;;  %v1767_v3 = vsel %vm903_vm7, %v4604_v51, %v1766_v1  ;;  %v656_v30 = vsel %vm631_vm6, %v4339_v13, %v655_v54  ;;  %v3155_v51 = vld [vmem:[%s5118_s1 + $0x80] sm:$0xff]  ;;  %v3156_v13 = vld [vmem:[%s5118_s1 + $0x88] sm:$0xf]  ;;  %v661_v1 = vsel %vm631_vm6, %v4453_v58, %v660_v5  ;;  %v667_v54 = vrot.slane %v4437_v45, 1 }
  0x7b   : > { %v5199_v46 = vld [vmem:[#allocation18_spill] sm:$0xff] }
  0x7c   : > { %3506 = vmatmul.mubr.msk.f32.gmra.mrb[12].mxu0 %vm377_vm5, %v1762_v47  ;;  %3385 = vmatmul.mubr.msk.f32.gmra.mrb[6].mxu1 %vm377_vm5, %v651_v23  ;;  %v4764_v47 = vsel %vm631_vm6, %v657_v42, %v4453_v58  ;;  %v4767_v23 = vld [vmem:[%s4231_s29 + $0xa0] sm:$0x3]  ;;  %v4787_v42 = vsel %vm631_vm6, %v662_v53, %v4494_v21  ;;  %v5191_v58 = vld [vmem:[#allocation12_spill] sm:$0xff] }
  0x7d   : > { %3508 = vmatprep.mubr.msk.f32.mxu0 %vm377_vm5, %v4743_v26  ;;  %3387 = vmatprep.mubr.msk.f32.mxu1 %vm377_vm5, %v4363_v19  ;;  %v665_v15 = vrot.slane %v4767_v23, 1  ;;  %v912_v26 = vrot.slane %v5198_v35, 2  ;;  %v5213_v37 = vld [vmem:[#allocation29_spill] sm:$0xff] }
  0x7f   : > { %v666_v5 = vsel %vm631_vm6, %v4494_v21, %v665_v15  ;;  %v907_v15 = vrot.slane %v5196_v4, 2  ;;  %v5204_v4 = vld [vmem:[#allocation19_spill] sm:$0xff] }
  0x80   : > { %3509 = vmatmul.mubr.msk.f32.gmra.mrb[14].mxu0 %vm377_vm5, %v1767_v3  ;;  %3388 = vmatmul.mubr.msk.f32.gmra.mrb[8].mxu1 %vm377_vm5, %v656_v30  ;;  %v4790_v3 = vld [vmem:[%s4231_s29 + $0xb8] sm:$0x3]  ;;  %v3643_v30 = vpack.c.bf16 %v3156_v13, %v3155_v51  ;;  %s3876_s29 = scalar_lea.vmem %s3875_s24, 4096 }
  0x81   : > { %3515 = vmatprep.mubr.msk.f32.mxu0 %vm377_vm5, %v4251_v50  ;;  %3390 = vmatprep.mubr.msk.f32.mxu1 %vm377_vm5, %v4764_v47  ;;  %v670_v53 = vrot.slane %v4790_v3, 1  ;;  %v5192_v51 = vld [vmem:[#allocation8_spill] sm:$0xff]  ;;  %p3878_p5 = scmp.lt.s32.totalorder %s3876_s29, %s3870_s20 }
  0x82   : > { %v904_v13 = vrot.slane %v5192_v51, 2  ;;  %v5197_v51 = vld [vmem:[#allocation15_spill] sm:$0xff] }
  0x83   : > { %v671_v21 = vsel %vm631_vm6, %v4509_v14, %v670_v53  ;;  %v5201_v53 = vld [vmem:[#allocation16_spill] sm:$0xff]  ;;  %p3879_p6 = por %p3878_p5, %p3877_p4 }
  0x84   : > { %3516 = vmatmul.mubr.msk.f32.vlgmr.msra.gmra.mrb[0].mxu0 %vm377_vm5, %v4274_v57  ;;  %3391 = vmatmul.mubr.msk.f32.gmra.mrb[10].mxu1 %vm377_vm5, %v661_v1  ;;  %v5194_v1 = vld [vmem:[#allocation13_spill] sm:$0xff] }
  0x85   : > { %3642 = vmatpush3.bf16.msk.msra.mxu0 %vm4202_vm4, %v4448_v55  ;;  %3518 = vmatprep.mubr.msk.f32.mxu0 %vm377_vm5, %v5191_v58  ;;  %v4809_v55 = vsel %vm631_vm6, %v667_v54, %v4509_v14  ;;  %v906_v54 = vsel %vm903_vm7, %v904_v13, %v905_v22  ;;  %v5200_v14 = vld [vmem:[#allocation17_spill] sm:$0xff]  ;;  %p3880_p7 = pnand %p3879_p6, %p3873_p2 }
  0x86   : > { %3393 = vmatprep.mubr.msk.f32.mxu1 %vm377_vm5, %v4787_v42  ;;  %3645 = vmatprep.subr.msk.bf16.mxu0 %vm4202_vm4, %v3643_v30  ;;  %v5202_v13 = vld [vmem:[#allocation25_spill] sm:$0xff] }
  0x87   : > { %v917_v35 = vrot.slane %v5202_v13, 2  ;;  %v932_v13 = vrot.slane %v4748_v33, 2 }
  0x88   : > { %3519 = vmatmul.mubr.msk.f32.gmra.mrb[2].mxu0 %vm377_vm5, %v5194_v1  ;;  %3394 = vmatmul.mubr.msk.f32.gmra.mrb[12].mxu1 %vm377_vm5, %v666_v5  ;;  %v908_v5 = vsel %vm903_vm7, %v905_v22, %v907_v15  ;;  %v913_v22 = vsel %vm903_vm7, %v5201_v53, %v912_v26  ;;  %v922_v15 = vrot.slane %v4502_v29, 2  ;;  %v927_v53 = vrot.slane %v4699_v60, 2  ;;  %v5210_v60 = vld [vmem:[#allocation28_spill] sm:$0xff] }
  0x89   : > { %3521 = vmatprep.mubr.msk.f32.mxu0 %vm377_vm5, %v5195_v25  ;;  %3396 = vmatprep.mubr.msk.f32.mxu1 %vm377_vm5, %v4809_v55  ;;  %v918_v26 = vsel %vm903_vm7, %v4389_v27, %v917_v35  ;;  %v5209_v27 = vld [vmem:[#allocation26_spill] sm:$0xff] }
  0x8a   : > { %v928_v29 = vsel %vm903_vm7, %v4430_v43, %v927_v53  ;;  %v942_v43 = vrot.slane %v4790_v3, 2 }
  0x8c   : > { %3522 = vmatmul.mubr.msk.f32.gmra.mrb[4].mxu0 %vm377_vm5, %v5197_v51  ;;  %3397 = vmatmul.mubr.msk.f32.gmra.mrb[14].mxu1 %vm377_vm5, %v671_v21  ;;  %v5203_v21 = vld [vmem:[#allocation7_spill] sm:$0xff] }
  0x8d   : > { %3524 = vmatprep.mubr.msk.f32.mxu0 %vm377_vm5, %v4392_v28  ;;  %3403 = vmatprep.mubr.msk.f32.mxu1 %vm377_vm5, %v906_v54  ;;  %v5206_v54 = vld [vmem:[#allocation21_spill] sm:$0xff] }
  0x90   : > { %3525 = vmatmul.mubr.msk.f32.gmra.mrb[6].mxu0 %vm377_vm5, %v5199_v46  ;;  %3404 = vmatmul.mubr.msk.f32.vlgmr.msra.gmra.mrb[0].mxu1 %vm377_vm5, %v908_v5  ;;  %v5207_v5 = vld [vmem:[#allocation24_spill] sm:$0xff] }
  0x91   : > { %3527 = vmatprep.mubr.msk.f32.mxu0 %vm377_vm5, %v4424_v41  ;;  %3618 = vmatpush3.bf16.msk.msra.mxu1 %vm4202_vm4, %v4614_v61  ;;  %v5205_v61 = vld [vmem:[#allocation20_spill] sm:$0xff] }
  0x92   : > { %3406 = vmatprep.mubr.msk.f32.mxu1 %vm377_vm5, %v5200_v14  ;;  %3649 = vmatprep.subr.msk.bf16.mxu1 %vm4202_vm4, %v5203_v21  ;;  %v923_v14 = vsel %vm903_vm7, %v4406_v32, %v922_v15  ;;  %v933_v32 = vsel %vm903_vm7, %v4456_v59, %v932_v13  ;;  %v2311_v59 = vrot.slane %v4533_v44, 1 }
  0x94   : > { %3528 = vmatmul.mubr.msk.f32.gmra.mrb[8].mxu0 %vm377_vm5, %v5204_v4  ;;  %3407 = vmatmul.mubr.msk.f32.gmra.mrb[2].mxu1 %vm377_vm5, %v913_v22  ;;  %v5208_v22 = vld [vmem:[#allocation27_spill] sm:$0xff] }
  0x95   : > { %3530 = vmatprep.mubr.msk.f32.mxu0 %vm377_vm5, %v4437_v45  ;;  %3409 = vmatprep.mubr.msk.f32.mxu1 %vm377_vm5, %v5205_v61 }
  0x98   : > { %3531 = vmatmul.mubr.msk.f32.gmra.mrb[10].mxu0 %vm377_vm5, %v5206_v54  ;;  %3410 = vmatmul.mubr.msk.f32.gmra.mrb[4].mxu1 %vm377_vm5, %v918_v26 }
  0x99   : > { %3533 = vmatprep.mubr.msk.f32.mxu0 %vm377_vm5, %v4533_v44  ;;  %3412 = vmatprep.mubr.msk.f32.mxu1 %vm377_vm5, %v5207_v5 }
  0x9c   : > { %3534 = vmatmul.mubr.msk.f32.gmra.mrb[12].mxu0 %vm377_vm5, %v5208_v22  ;;  %3413 = vmatmul.mubr.msk.f32.gmra.mrb[6].mxu1 %vm377_vm5, %v923_v14 }
  0x9d   : > { %3536 = vmatprep.mubr.msk.f32.mxu0 %vm377_vm5, %v4568_v7  ;;  %3415 = vmatprep.mubr.msk.f32.mxu1 %vm377_vm5, %v5209_v27  ;;  %v937_v7 = vrot.slane %v4767_v23, 2 }
  0xa0   : > { %3537 = vmatmul.mubr.msk.f32.gmra.mrb[14].mxu0 %vm377_vm5, %v4584_v16  ;;  %3416 = vmatmul.mubr.msk.f32.gmra.mrb[8].mxu1 %vm377_vm5, %v928_v29 }
  0xa1   : > { %3543 = vmatprep.mubr.msk.f32.mxu0 %vm377_vm5, %v4320_v8  ;;  %3418 = vmatprep.mubr.msk.f32.mxu1 %vm377_vm5, %v4529_v49  ;;  %v938_v8 = vsel %vm903_vm7, %v4470_v9, %v937_v7  ;;  %v2313_v9 = vsel %vm631_vm6, %v2311_v59, %v4607_v2 }
  0xa4   : > { %3544 = vmatmul.mubr.msk.f32.vlgmr.msra.gmra.mrb[0].mxu0 %vm377_vm5, %v5210_v60  ;;  %3419 = vmatmul.mubr.msk.f32.gmra.mrb[10].mxu1 %vm377_vm5, %v933_v32 }
  0xa5   : > { %3648 = vmatpush3.bf16.msk.msra.mxu0 %vm4202_vm4, %v3643_v30  ;;  %3546 = vmatprep.mubr.msk.f32.mxu0 %vm377_vm5, %v4335_v11  ;;  %v943_v11 = vsel %vm903_vm7, %v4489_v17, %v942_v43 }
  0xa6   : > { %3421 = vmatprep.mubr.msk.f32.mxu1 %vm377_vm5, %v4548_v56 }
  0xa8   : > { %3547 = vmatmul.mubr.msk.f32.gmra.mrb[2].mxu0 %vm377_vm5, %v4611_v0  ;;  %3422 = vmatmul.mubr.msk.f32.gmra.mrb[12].mxu1 %vm377_vm5, %v938_v8  ;;  %v5211_v0 = vld [vmem:[#allocation10_spill] sm:$0xff] }
  0xa9   : > { %3549 = vmatprep.mubr.msk.f32.mxu0 %vm377_vm5, %v4363_v19  ;;  %3424 = vmatprep.mubr.msk.f32.mxu1 %vm377_vm5, %v4552_v48  ;;  %v5212_v19 = vld [vmem:[#allocation11_spill] sm:$0xff] }
  0xac   : > { %3550 = vmatmul.mubr.msk.f32.gmra.mrb[4].mxu0 %vm377_vm5, %v4618_v18  ;;  %3425 = vmatmul.mubr.msk.f32.gmra.mrb[14].mxu1 %vm377_vm5, %v943_v11 }
  0xad   : > { %3552 = vmatprep.mubr.msk.f32.mxu0 %vm377_vm5, %v4764_v47  ;;  %3431 = vmatprep.mubr.msk.f32.mxu1 %vm377_vm5, %v5211_v0 }
  0xb0   : > { %3553 = vmatmul.mubr.msk.f32.gmra.mrb[6].mxu0 %vm377_vm5, %v4628_v40  ;;  %3432 = vmatmul.mubr.msk.f32.vlgmr.msra.gmra.mrb[0].mxu1 %vm377_vm5, %v5212_v19  ;;  %v5019_v40 = vld [vmem:[%s5119_s2] ss:$0 sm:$0xff] }
  0xb1   : > { %3555 = vmatprep.mubr.msk.f32.mxu0 %vm377_vm5, %v4787_v42  ;;  %3650 = vmatpush3.bf16.msk.msra.mxu1 %vm4202_vm4, %v5203_v21 }
  0xb2   : > { %3434 = vmatprep.mubr.msk.f32.mxu1 %vm377_vm5, %v4251_v50  ;;  %v5215_v50 = vld [vmem:[#allocation31_spill] sm:$0xff] }
  0xb4   : > { %3556 = vmatmul.mubr.msk.f32.gmra.mrb[8].mxu0 %vm377_vm5, %v4632_v20  ;;  %3435 = vmatmul.mubr.msk.f32.gmra.mrb[2].mxu1 %vm377_vm5, %v4274_v57  ;;  %v5216_v57 = vld [vmem:[#allocation32_spill] sm:$0xff] }
  0xb5   : > { %3558 = vmatprep.mubr.msk.f32.mxu0 %vm377_vm5, %v4809_v55  ;;  %3437 = vmatprep.mubr.msk.f32.mxu1 %vm377_vm5, %v5191_v58 }
  0xb8   : > { %3559 = vmatmul.mubr.msk.f32.gmra.mrb[10].mxu0 %vm377_vm5, %v4644_v12  ;;  %3438 = vmatmul.mubr.msk.f32.gmra.mrb[4].mxu1 %vm377_vm5, %v5194_v1 }
  0xb9   : > { %3561 = vmatprep.mubr.msk.f32.mxu0 %vm377_vm5, %v2313_v9  ;;  %3440 = vmatprep.mubr.msk.f32.mxu1 %vm377_vm5, %v5195_v25 }
  0xbc   : > { %3562 = vmatmul.mubr.msk.f32.gmra.mrb[12].mxu0 %vm377_vm5, %v4648_v31  ;;  %3441 = vmatmul.mubr.msk.f32.gmra.mrb[6].mxu1 %vm377_vm5, %v5197_v51 }
  0xbd   : > { %3564 = vmatprep.mubr.msk.f32.mxu0 %vm377_vm5, %v4635_v38  ;;  %3443 = vmatprep.mubr.msk.f32.mxu1 %vm377_vm5, %v4392_v28  ;;  %v5218_v28 = vld [vmem:[#allocation33_spill] sm:$0xff] }
  0xc0   : > { %3565 = vmatmul.mubr.msk.f32.gmra.mrb[14].mxu0 %vm377_vm5, %v4656_v24  ;;  %3444 = vmatmul.mubr.msk.f32.gmra.mrb[8].mxu1 %vm377_vm5, %v5199_v46 }
  0xc1   : > { %3571 = vmatprep.mubr.msk.f32.mxu0 %vm377_vm5, %v5205_v61  ;;  %3446 = vmatprep.mubr.msk.f32.mxu1 %vm377_vm5, %v4424_v41 }
  0xc4   : > { %3572 = vmatmul.mubr.msk.f32.vlgmr.msra.gmra.mrb[0].mxu0 %vm377_vm5, %v4668_v10  ;;  %3447 = vmatmul.mubr.msk.f32.gmra.mrb[10].mxu1 %vm377_vm5, %v5204_v4 }
  0xc5   : > { %3574 = vmatprep.mubr.msk.f32.mxu0 %vm377_vm5, %v5207_v5  ;;  %3449 = vmatprep.mubr.msk.f32.mxu1 %vm377_vm5, %v4437_v45 }
  0xc8   : > { %3575 = vmatmul.mubr.msk.f32.gmra.mrb[2].mxu0 %vm377_vm5, %v4672_v34  ;;  %3450 = vmatmul.mubr.msk.f32.gmra.mrb[12].mxu1 %vm377_vm5, %v5206_v54 }
  0xc9   : > { %3577 = vmatprep.mubr.msk.f32.mxu0 %vm377_vm5, %v5209_v27  ;;  %3452 = vmatprep.mubr.msk.f32.mxu1 %vm377_vm5, %v4533_v44 }
  0xcc   : > { %3578 = vmatmul.mubr.msk.f32.gmra.mrb[4].mxu0 %vm377_vm5, %v4681_v36  ;;  %3453 = vmatmul.mubr.msk.f32.gmra.mrb[14].mxu1 %vm377_vm5, %v5208_v22 }
  0xcd   : > { %3580 = vmatprep.mubr.msk.f32.mxu0 %vm377_vm5, %v4529_v49  ;;  %3471 = vmatprep.mubr.msk.f32.mxu1 %vm377_vm5, %v4764_v47  ;;  %v5214_v49 = vld [vmem:[#allocation34_spill] sm:$0xff] }
  0xd0   : > { %3581 = vmatmul.mubr.msk.f32.gmra.mrb[6].mxu0 %vm377_vm5, %v4685_v62  ;;  %3472 = vmatmul.mubr.msk.f32.vlgmr.msra.gmra.mrb[8].mxu1 %vm377_vm5, %v4663_v63 }
  0xd1   : > { %3583 = vmatprep.mubr.msk.f32.mxu0 %vm377_vm5, %v4548_v56  ;;  %3474 = vmatprep.mubr.msk.f32.mxu1 %vm377_vm5, %v4787_v42 }
  0xd4   : > { %3584 = vmatmul.mubr.msk.f32.gmra.mrb[8].mxu0 %vm377_vm5, %v4692_v6  ;;  %3475 = vmatmul.mubr.msk.f32.gmra.mrb[10].mxu1 %vm377_vm5, %v4696_v39 }
  0xd5   : > { %3586 = vmatprep.mubr.msk.f32.mxu0 %vm377_vm5, %v4552_v48  ;;  %3477 = vmatprep.mubr.msk.f32.mxu1 %vm377_vm5, %v4809_v55  ;;  %v5217_v48 = vld [vmem:[#allocation30_spill] sm:$0xff] }
  0xd8   : > { %3587 = vmatmul.mubr.msk.f32.gmra.mrb[10].mxu0 %vm377_vm5, %v4703_v52  ;;  %3478 = vmatmul.mubr.msk.f32.gmra.mrb[12].mxu1 %vm377_vm5, %v5213_v37 }
  0xd9   : > { %3589 = vmatprep.mubr.msk.f32.mxu0 %vm377_vm5, %v5214_v49  ;;  %3480 = vmatprep.mubr.msk.f32.mxu1 %vm377_vm5, %v2313_v9 }
  0xdc   : > { %3590 = vmatmul.mubr.msk.f32.gmra.mrb[12].mxu0 %vm377_vm5, %v5215_v50  ;;  %3481 = vmatmul.mubr.msk.f32.gmra.mrb[14].mxu1 %vm377_vm5, %v5216_v57 }
  0xdd   : > { %3592 = vmatprep.mubr.msk.f32.mxu0 %vm377_vm5, %v5217_v48 }
  0xe0   : > { %3593 = vmatmul.mubr.msk.f32.gmra.mrb[14].mxu0 %vm377_vm5, %v5218_v28 }
 0x183   : > { %v3433_v41 = vpop.f32.mrb[0].mxu1 }
 0x184   : > { %v1322_v44 = vpop.f32.mrb[1].mxu1  ;;  %v3651_v20 = vadd.f32 %v3433_v41, %v5019_v40 }
 0x185   : > { %v3653_v38 = vadd.f32 %v5019_v40, %v1322_v44 }
 0x187   : > { %v3436_v45 = vpop.f32.mrb[2].mxu1 }
 0x188   : > { %v1332_v17 = vpop.f32.mrb[3].mxu1  ;;  %v3655_v10 = vadd.f32 %v3436_v45, %v5019_v40 }
 0x189   : > { %v3657_v34 = vadd.f32 %v5019_v40, %v1332_v17 }
 0x18b   : > { %v3439_v2 = vpop.f32.mrb[4].mxu1 }
 0x18c   : > { %v1342_v56 = vpop.f32.mrb[5].mxu1  ;;  %v3659_v52 = vadd.f32 %v3439_v2, %v5019_v40 }
 0x18d   : > { %v3661_v46 = vadd.f32 %v5019_v40, %v1342_v56 }
 0x18f   : > { %v3442_v16 = vpop.f32.mrb[6].mxu1 }
 0x190   : > { %v1352_v18 = vpop.f32.mrb[7].mxu1  ;;  %v3663_v42 = vadd.f32 %v3442_v16, %v5019_v40 }
 0x191   : > { %v3665_v3 = vadd.f32 %v5019_v40, %v1352_v18 }
 0x197   : > { %v3573_v12 = vpop.f32.mrb[0].mxu0 }
 0x198   : > { %v3652_v31 = vadd.f32 %v3651_v20, %v3573_v12  ;;  %v2696_v24 = vpop.f32.mrb[1].mxu0 }
 0x199   : > { %v3654_v63 = vadd.f32 %v3653_v38, %v2696_v24 }
 0x19a   : > { %2824 = vst [vmem:[%s4072_s11 + $0x8] sm:$0xff] %v3652_v31 }
 0x19b   : > { %2823 = vst [vmem:[%s4072_s11] sm:$0xff] %v3654_v63  ;;  %v3576_v36 = vpop.f32.mrb[2].mxu0 }
 0x19c   : > { %v3656_v62 = vadd.f32 %v3655_v10, %v3576_v36  ;;  %v2706_v6 = vpop.f32.mrb[3].mxu0 }
 0x19d   : > { %v3658_v39 = vadd.f32 %v3657_v34, %v2706_v6 }
 0x19e   : > { %2826 = vst [vmem:[%s4072_s11 + $0x18] sm:$0xff] %v3656_v62 }
 0x19f   : > { %2825 = vst [vmem:[%s4072_s11 + $0x10] sm:$0xff] %v3658_v39  ;;  %v3579_v25 = vpop.f32.mrb[4].mxu0 }
 0x1a0   : > { %v3660_v33 = vadd.f32 %v3659_v52, %v3579_v25  ;;  %v2716_v47 = vpop.f32.mrb[5].mxu0 }
 0x1a1   : > { %v3662_v23 = vadd.f32 %v3661_v46, %v2716_v47 }
 0x1a2   : > { %2828 = vst [vmem:[%s4072_s11 + $0x28] sm:$0xff] %v3660_v33 }
 0x1a3   : > { %2827 = vst [vmem:[%s4072_s11 + $0x20] sm:$0xff] %v3662_v23  ;;  %v3582_v30 = vpop.f32.mrb[6].mxu0  ;;  %v3473_v1 = vpop.f32.mrb[8].mxu1 }
 0x1a4   : > { %v3664_v58 = vadd.f32 %v3663_v42, %v3582_v30  ;;  %v2726_v55 = vpop.f32.mrb[7].mxu0  ;;  %v3667_v35 = vadd.f32 %v3473_v1, %v5019_v40  ;;  %v1641_v21 = vpop.f32.mrb[9].mxu1 }
 0x1a5   : > { %v3666_v51 = vadd.f32 %v3665_v3, %v2726_v55  ;;  %v3669_v4 = vadd.f32 %v5019_v40, %v1641_v21 }
 0x1a6   : > { %2830 = vst [vmem:[%s4072_s11 + $0x38] sm:$0xff] %v3664_v58 }
 0x1a7   : > { %2829 = vst [vmem:[%s4072_s11 + $0x30] sm:$0xff] %v3666_v51  ;;  %v3585_v61 = vpop.f32.mrb[8].mxu0  ;;  %v3476_v54 = vpop.f32.mrb[10].mxu1 }
 0x1a8   : > { %v3668_v26 = vadd.f32 %v3667_v35, %v3585_v61  ;;  %v2736_v15 = vpop.f32.mrb[9].mxu0  ;;  %v3671_v14 = vadd.f32 %v3476_v54, %v5019_v40  ;;  %v1651_v53 = vpop.f32.mrb[11].mxu1 }
 0x1a9   : > { %v3670_v5 = vadd.f32 %v3669_v4, %v2736_v15  ;;  %v3673_v22 = vadd.f32 %v5019_v40, %v1651_v53 }
 0x1aa   : > { %2832 = vst [vmem:[%s4072_s11 + $0x48] sm:$0xff] %v3668_v26 }
 0x1ab   : > { %2831 = vst [vmem:[%s4072_s11 + $0x40] sm:$0xff] %v3670_v5  ;;  %v3588_v27 = vpop.f32.mrb[10].mxu0  ;;  %v3479_v32 = vpop.f32.mrb[12].mxu1 }
 0x1ac   : > { %v3672_v29 = vadd.f32 %v3671_v14, %v3588_v27  ;;  %v2746_v13 = vpop.f32.mrb[11].mxu0  ;;  %v3675_v60 = vadd.f32 %v3479_v32, %v5019_v40  ;;  %v1661_v8 = vpop.f32.mrb[13].mxu1 }
 0x1ad   : > { %v3674_v7 = vadd.f32 %v3673_v22, %v2746_v13  ;;  %v3677_v43 = vadd.f32 %v5019_v40, %v1661_v8 }
 0x1ae   : > { %2834 = vst [vmem:[%s4072_s11 + $0x58] sm:$0xff] %v3672_v29 }
 0x1af   : > { %2833 = vst [vmem:[%s4072_s11 + $0x50] sm:$0xff] %v3674_v7  ;;  %v3591_v11 = vpop.f32.mrb[12].mxu0  ;;  %v3482_v59 = vpop.f32.mrb[14].mxu1 }
 0x1b0   : > { %v3676_v0 = vadd.f32 %v3675_v60, %v3591_v11  ;;  %v2756_v19 = vpop.f32.mrb[13].mxu0  ;;  %v3679_v37 = vadd.f32 %v3482_v59, %v5019_v40  ;;  %v1671_v49 = vpop.f32.mrb[15].mxu1 }
 0x1b1   : > { %v3678_v9 = vadd.f32 %v3677_v43, %v2756_v19  ;;  %v3681_v50 = vadd.f32 %v5019_v40, %v1671_v49 }
 0x1b2   : > { %2836 = vst [vmem:[%s4072_s11 + $0x68] sm:$0xff] %v3676_v0 }
 0x1b3   : > { %2835 = vst [vmem:[%s4072_s11 + $0x60] sm:$0xff] %v3678_v9  ;;  %v3594_v57 = vpop.f32.mrb[14].mxu0 }
 0x1b4   : > { %v3680_v48 = vadd.f32 %v3679_v37, %v3594_v57  ;;  %v2766_v28 = vpop.f32.mrb[15].mxu0 }
 0x1b5   : > { %v3682_v41 = vadd.f32 %v3681_v50, %v2766_v28 }
 0x1b6   : > { %2838 = vst [vmem:[%s4072_s11 + $0x78] sm:$0xff] %v3680_v48 }
 0x1b7   : > { %2837 = vst [vmem:[%s4072_s11 + $0x70] sm:$0xff] %v3682_v41 }
 0x1b8   : > { %3883 = shalt.err (!%p3880_p7)
}
 0x1b9   : > { %s3884_s4 = scalar_lea.hbm %s5057_s9, 2048  ;;  %s3888_s28 = scalar_lea.hbm %s5120_s3, 8192 }
 0x1ba   : > { %p3885_p9 = scmp.ne.s32.totalorder %s5057_s9, %s3884_s4  ;;  %p3889_p12 = scmp.lt.u32.totalorder %s5057_s9, %s5120_s3 }
 0x1bb   : > { %p3890_p13 = scmp.lt.u32.totalorder %s3888_s28, %s3884_s4  ;;  %p3892_p1 = scmp.lt.u32.totalorder %s3884_s4, %s5057_s9 }
 0x1bc   : > { %p3886_p10 = pnand %p3885_p9, %p4042_p3 }
 0x1bd   : > { %p3891_p0 = por %p3890_p13, %p3889_p12 }
 0x1be   : > { %p3887_p11 = pneg %p3886_p10 }
 0x1bf   : > { %p3893_p2 = por %p3892_p1, %p3891_p0 }
 0x1c1   : > { %p3894_p4 = pnand %p3893_p2, %p3887_p11 }
 0x1c3   : > { %3897 = shalt.err (!%p3894_p4)
}
 0x1c4   : > { %s3969_s15 = smov 128   ;;  %s3970_s7 = smov 8  }
 0x1c5   : > { %3795 = dma.vmem_to_hbm [thread:$0]  (%p4042_p3), %s5059_s16, 2048, %s5057_s9, %s5065_s10, %s3969_s15, %s3969_s15, %s3970_s7  }
 0x1c6 PF: > { %p3801_p5 = scmp.ge.s32.totalorder %s3964_s19, 2  ;;  %s2870_s8 = sand.u32 1, %s3936_s12  }
 0x1c7   : > { %s2871_s20 = scalar_lea.sflag [#allocation5], %s2870_s8 }
 0x1c8   : > { %p3798_p6 = pnand %p3801_p5, %p4051_p8 }
 0x1ca   : > { %3931 = dma.done.wait (!%p3798_p6), %s2871_s20, 2048  }
 0x1cb   : > { %3933 = vsyncadd (!%p3798_p6), %s2871_s20, 4294965248  ;;  %s16_s19 = sadd.s32 1, %s3964_s19   ;;  %s5219_s12 = smov %s3940_s13 }
 0x1cc   : > { %p13_p7 = scmp.ge.s32.totalorder %s16_s19, 6   ;;  %s5220_s13 = smov %s3944_s14 }
 0x1cd   : > { %s5221_s14 = smov %s4060_s30  ;;  %s5222_s15 = smov %s3956_s17 }
 0x1ce   : > { %s5223_s16 = smov %s3960_s18  ;;  %s5224_s17 = smov %s5227_s22 }
 0x1cf   : > { %s5225_s18 = smov %s5231_s23  ;;  %15 = sbr.rel (!%p13_p7) target bundleno = 5 (0x5), region = 83 }
 0x1d6   :  { %2876 = vsyncpa [#allocation5], 1 }
 0x1d7   :  { %2878 = vsyncpa [#allocation5 + $0x1], 1 }

</bundles_post_ra>
